<compile_context>
chip_gen: v7x
topology: tpu7x:2x2x1
jax: 0.10.0
libtpu: 0.0.40
codegen_flags: <defaults>
</compile_context>

<pallas_src>
import math
import functools

import jax
import jax.numpy as jnp
from jax.experimental import pallas as pl
from jax.experimental.pallas import tpu as pltpu


# ----------------------------------------------------------------------------
# Pallas kernel: full encoder stack, grid = (batch_tiles, layers)
# ----------------------------------------------------------------------------
def _encoder_stack_kernel(x_hbm_ref, wqkv_ref, wo_ref, bo_ref,
                          w1_ref, b1_ref, w2_ref, b2_ref,
                          g1_ref, bt1_ref, g2_ref, bt2_ref,
                          o_ref, *, n_heads, eps, batch_tile):
    bt = pl.program_id(0)
    layer = pl.program_id(1)
    Bt, S, D = o_ref.shape
    BS = Bt * S
    H = n_heads
    dk = D // H

    # Layer 0 of each batch tile: DMA the embedded+PE input straight into the
    # output block, which then serves as the resident residual stream for all
    # layers (no separate activation scratch, no second resident copy of x).
    @pl.when(layer == 0)
    def _():
        pltpu.sync_copy(x_hbm_ref.at[pl.ds(bt * batch_tile, batch_tile)], o_ref)

    x = o_ref[...].reshape(BS, D)                       # [BS, D] f32 residual
    x_bf = x.astype(jnp.bfloat16)                       # cast once per layer

    # ---- fused QKV projection: one lane-dense (BS, D) @ (D, 3D) matmul ------
    # (1/sqrt(dk) is pre-folded into the Q columns of wqkv in the wrapper.)
    qkv = jnp.dot(x_bf, wqkv_ref[0], preferred_element_type=jnp.float32)

    def split_heads(base):
        # (BS, D) lane chunk of qkv -> (H*Bt, S, dk) with heads folded into
        # the batch axis (static lane slices + leading-dim concat only).
        return jnp.concatenate(
            [qkv[:, base + h * dk: base + (h + 1) * dk].reshape(Bt, S, dk)
             for h in range(H)], axis=0)

    q = split_heads(0).astype(jnp.bfloat16)
    k = split_heads(D).astype(jnp.bfloat16)
    v = split_heads(2 * D).astype(jnp.bfloat16)

    # ---- attention core: single einsums batched over B*H --------------------
    # TODO(synk): for large S switch to a K-tiled online-softmax (flash-style)
    #             loop instead of materializing the full (B*H, S, S) scores.
    # TODO(synk): optional padding mask not implemented (mask=None path only).
    s = jnp.einsum('bqd,bkd->bqk', q, k,
                   preferred_element_type=jnp.float32)          # (H*Bt, S, S)
    s = s - jnp.max(s, axis=-1, keepdims=True)
    p = jnp.exp(s)
    p = p * pl.reciprocal(jnp.sum(p, axis=-1, keepdims=True), approx=True)
    ctx = jnp.einsum('bqk,bkd->bqd', p.astype(jnp.bfloat16), v,
                     preferred_element_type=jnp.float32)        # (H*Bt, S, dk)

    # ---- merge heads along lanes, single (BS, D) @ (D, D) output projection -
    ctx_cat = jnp.concatenate(
        [ctx[h * Bt:(h + 1) * Bt].reshape(BS, dk) for h in range(H)], axis=-1)
    attn = jnp.dot(ctx_cat.astype(jnp.bfloat16), wo_ref[0],
                   preferred_element_type=jnp.float32) + bo_ref[0]

    def layer_norm(y, gamma, beta):
        mean = jnp.mean(y, axis=-1, keepdims=True)
        cent = y - mean
        var = jnp.mean(cent * cent, axis=-1, keepdims=True)     # two-pass var
        return gamma * (cent * jax.lax.rsqrt(var + eps)) + beta

    # ---- AddNorm 1 (dropout = identity at inference) -------------------------
    h1 = layer_norm(x + attn, g1_ref[0], bt1_ref[0])

    # ---- feed-forward ---------------------------------------------------------
    hid = jnp.dot(h1.astype(jnp.bfloat16), w1_ref[0],
                  preferred_element_type=jnp.float32) + b1_ref[0]
    hid = jnp.maximum(hid, 0.0)
    ff = jnp.dot(hid.astype(jnp.bfloat16), w2_ref[0],
                 preferred_element_type=jnp.float32) + b2_ref[0]

    # ---- AddNorm 2: write back into the resident output block (layer carry) --
    h2 = layer_norm(h1 + ff, g2_ref[0], bt2_ref[0])
    o_ref[...] = h2.reshape(Bt, S, D).astype(o_ref.dtype)


def encoder_stack_pallas(x, stacked, n_heads, eps=1e-6, batch_tile=None):
    """x: [B, S, D] float32 (embedded + positional); stacked: layer-stacked params."""
    B, S, D = x.shape
    L = stacked["wqkv"].shape[0]
    d_ff = stacked["w1"].shape[-1]
    dk = D // n_heads

    if batch_tile is None:
        # One tile keeps the MXU M-dim as large as possible for small demos;
        # set batch_tile < B at large batch to expose the leading "parallel"
        # axis (e.g. to use both TensorCores on v7x) and shrink per-core VMEM.
        batch_tile = B
    assert B % batch_tile == 0
    n_bt = B // batch_tile

    names = ("wqkv", "wo", "bo", "w1", "b1", "w2", "b2", "g1", "bt1", "g2", "bt2")
    params = [stacked[k] for k in names]

    def wspec(arr):
        return pl.BlockSpec((1,) + arr.shape[1:], lambda bt, l: (l, 0, 0))

    # VMEM budget derived from real buffer sizes (not a hard-coded cap):
    # double-buffered per-layer weight slab + resident output block + live
    # f32 intermediates (qkv / ffn hidden / scores), plus headroom.
    weight_slab = sum((int(p.size) // L) * p.dtype.itemsize for p in params)
    out_block = batch_tile * S * D * 4
    interm = (batch_tile * S * (3 * D + d_ff) * 4
              + 2 * n_heads * batch_tile * S * S * 4)
    need = 2 * weight_slab + 2 * out_block + 2 * interm + (8 << 20)
    try:
        cap = int(pltpu.get_tpu_info().vmem_capacity_bytes * 0.85)
    except Exception:
        cap = 100 * 1024 * 1024
    vmem_limit = int(min(max(need, 32 << 20), cap))

    flops = L * (2 * B * S * D * (3 * D)                 # fused QKV projection
                 + 2 * B * S * D * D                     # output projection
                 + 2 * 2 * B * n_heads * S * S * dk      # scores + context
                 + 2 * 2 * B * S * D * d_ff)             # FFN
    transcendentals = L * B * n_heads * S * S
    bytes_accessed = (2 * B * S * D * 4
                      + sum(int(p.size) * p.dtype.itemsize for p in params))

    kernel = functools.partial(_encoder_stack_kernel, n_heads=n_heads,
                               eps=eps, batch_tile=batch_tile)
    return pl.pallas_call(
        kernel,
        out_shape=jax.ShapeDtypeStruct((B, S, D), jnp.float32),
        grid_spec=pltpu.PrefetchScalarGridSpec(
            num_scalar_prefetch=0,
            grid=(n_bt, L),
            in_specs=[pl.BlockSpec(memory_space=pl.ANY)]      # x stays in HBM
                     + [wspec(p) for p in params],
            out_specs=pl.BlockSpec((batch_tile, S, D), lambda bt, l: (bt, 0, 0)),
        ),
        compiler_params=pltpu.CompilerParams(
            dimension_semantics=("parallel", "arbitrary"),
            vmem_limit_bytes=vmem_limit,
        ),
        cost_estimate=pl.CostEstimate(flops=flops,
                                      transcendentals=transcendentals,
                                      bytes_accessed=bytes_accessed),
    )(x, *params)


# ----------------------------------------------------------------------------
# Parameter init (deterministic, mirrors the PyTorch module's shapes / inits)
# ----------------------------------------------------------------------------
def xavier_uniform(key, fan_in, fan_out):
    bound = math.sqrt(6.0 / (fan_in + fan_out))
    return jax.random.uniform(key, (fan_in, fan_out), jnp.float32, -bound, bound)


def make_positional_encoding(max_seq_len, d_model):
    pos = jnp.arange(max_seq_len, dtype=jnp.float32)[:, None]
    div = jnp.exp(jnp.arange(0, d_model, 2, dtype=jnp.float32)
                  * (-math.log(10000.0) / d_model))
    pe = jnp.zeros((max_seq_len, d_model), jnp.float32)
    pe = pe.at[:, 0::2].set(jnp.sin(pos * div))
    pe = pe.at[:, 1::2].set(jnp.cos(pos * div))
    return pe


def init_encoder_params(key, vocab_size, d_model, n_heads, n_layers, d_ff,
                        max_seq_len):
    dk = d_model // n_heads
    keys = jax.random.split(key, 1 + n_layers)
    emb = xavier_uniform(keys[0], vocab_size, d_model)
    pe = make_positional_encoding(max_seq_len, d_model)

    names = ("wqkv", "wo", "bo", "w1", "b1", "w2", "b2", "g1", "bt1", "g2", "bt2")
    per = {k: [] for k in names}
    for li in range(n_layers):
        ks = jax.random.split(keys[1 + li], 9)
        # Weights stored (in, out) so the kernel computes x @ W (== x @ W_torch.T).
        # The 1/sqrt(dk) attention scale is folded into the Q columns (benign
        # rounding difference vs. scaling scores in f32).
        wq = xavier_uniform(ks[0], d_model, d_model) / math.sqrt(dk)
        wk = xavier_uniform(ks[1], d_model, d_model)
        wv = xavier_uniform(ks[2], d_model, d_model)
        wo = xavier_uniform(ks[3], d_model, d_model)
        bo = jax.random.uniform(ks[4], (1, d_model), jnp.float32,
                                -1 / math.sqrt(d_model), 1 / math.sqrt(d_model))
        w1 = xavier_uniform(ks[5], d_model, d_ff)
        b1 = jax.random.uniform(ks[6], (1, d_ff), jnp.float32,
                                -1 / math.sqrt(d_model), 1 / math.sqrt(d_model))
        w2 = xavier_uniform(ks[7], d_ff, d_model)
        b2 = jax.random.uniform(ks[8], (1, d_model), jnp.float32,
                                -1 / math.sqrt(d_ff), 1 / math.sqrt(d_ff))

        per["wqkv"].append(jnp.concatenate([wq, wk, wv], axis=1))   # (D, 3D)
        per["wo"].append(wo)                                        # (D, D)
        per["bo"].append(bo)
        per["w1"].append(w1)
        per["b1"].append(b1)
        per["w2"].append(w2)
        per["b2"].append(b2)
        per["g1"].append(jnp.ones((1, d_model), jnp.float32))
        per["bt1"].append(jnp.zeros((1, d_model), jnp.float32))
        per["g2"].append(jnp.ones((1, d_model), jnp.float32))
        per["bt2"].append(jnp.zeros((1, d_model), jnp.float32))

    stacked = {k: jnp.stack(v, axis=0) for k, v in per.items()}
    # bf16 matmul operands (MXU-native); biases / LN params stay f32.
    # TODO(synk): on v7x, fp8 weights (f32 accumulation) would halve weight
    #             DMA/VMEM; generation-gated, not applied here.
    for k in ("wqkv", "wo", "w1", "w2"):
        stacked[k] = stacked[k].astype(jnp.bfloat16)
    return {"embedding": emb, "pe": pe, "layers": stacked}


# ----------------------------------------------------------------------------
# Full Encoder forward (inference: dropout = identity)
# ----------------------------------------------------------------------------
def encoder_forward(tokens, params, d_model, n_heads):
    # Glue outside the kernel: embedding gather + sqrt(d_model) scale + PE
    # (token gather has no clean rectangular BlockSpec form).
    x = params["embedding"][tokens] * math.sqrt(d_model)          # [B, S, D]
    x = x + params["pe"][: tokens.shape[1]][None]                 # [B, S, D]
    return encoder_stack_pallas(x, params["layers"], n_heads)


if __name__ == "__main__":
    vocab_size, d_model, n_heads, n_layers, d_ff, max_seq_len = 50, 128, 4, 2, 256, 64
    B, S = 2, 8

    key = jax.random.PRNGKey(0)
    pkey, tkey = jax.random.split(key)
    params = init_encoder_params(pkey, vocab_size, d_model, n_heads, n_layers,
                                 d_ff, max_seq_len)
    tokens = jax.random.randint(tkey, (B, S), 0, vocab_size, dtype=jnp.int32)

    out = encoder_forward(tokens, params, d_model, n_heads)
    out = jax.block_until_ready(out)
    assert out.shape == (B, S, d_model) and out.dtype == jnp.float32
    assert bool(jnp.all(jnp.isfinite(out)))
    print("KERNEL_OK")
</pallas_src>

<mosaic_0001>
module attributes {stable_mosaic.version = 11 : i64} {
  func.func @_encoder_stack_kernel(%arg0: i32, %arg1: i32, %arg2: memref<2x8x128xf32, #tpu.memory_space<any>>, %arg3: memref<1x128x384xbf16, #tpu.memory_space<vmem>>, %arg4: memref<1x128x128xbf16, #tpu.memory_space<vmem>>, %arg5: memref<1x1x128xf32, #tpu.memory_space<vmem>>, %arg6: memref<1x128x256xbf16, #tpu.memory_space<vmem>>, %arg7: memref<1x1x256xf32, #tpu.memory_space<vmem>>, %arg8: memref<1x256x128xbf16, #tpu.memory_space<vmem>>, %arg9: memref<1x1x128xf32, #tpu.memory_space<vmem>>, %arg10: memref<1x1x128xf32, #tpu.memory_space<vmem>>, %arg11: memref<1x1x128xf32, #tpu.memory_space<vmem>>, %arg12: memref<1x1x128xf32, #tpu.memory_space<vmem>>, %arg13: memref<1x1x128xf32, #tpu.memory_space<vmem>>, %arg14: memref<2x8x128xf32, #tpu.memory_space<vmem>>) attributes {dimension_semantics = [#tpu.dimension_semantics<parallel>, #tpu.dimension_semantics<arbitrary>], iteration_bounds = array<i64: 1, 2>, scalar_prefetch = 0 : i64, scratch_operands = 0 : i64, tpu.core_type = #tpu.core_type<tc>, window_params = [{}, {transform_indices = @transform_1, window_bounds = array<i64: 1, 128, 384>}, {transform_indices = @transform_2, window_bounds = array<i64: 1, 128, 128>}, {transform_indices = @transform_3, window_bounds = array<i64: 1, 1, 128>}, {transform_indices = @transform_4, window_bounds = array<i64: 1, 128, 256>}, {transform_indices = @transform_5, window_bounds = array<i64: 1, 1, 256>}, {transform_indices = @transform_6, window_bounds = array<i64: 1, 256, 128>}, {transform_indices = @transform_7, window_bounds = array<i64: 1, 1, 128>}, {transform_indices = @transform_8, window_bounds = array<i64: 1, 1, 128>}, {transform_indices = @transform_9, window_bounds = array<i64: 1, 1, 128>}, {transform_indices = @transform_10, window_bounds = array<i64: 1, 1, 128>}, {transform_indices = @transform_11, window_bounds = array<i64: 1, 1, 128>}, {transform_indices = @transform_12, window_bounds = array<i64: 2, 8, 128>}]} {
    %c0_i32 = arith.constant 0 : i32
    %0 = arith.cmpi eq, %arg1, %c0_i32 : i32
    %1 = arith.extui %0 : i1 to i32
    %c0_i32_0 = arith.constant 0 : i32
    %2 = arith.cmpi ne, %1, %c0_i32_0 : i32
    scf.if %2 {
      %c2_i32 = arith.constant 2 : i32
      %139 = arith.muli %arg0, %c2_i32 : i32
      "tpu.region"() ({
        %140 = tpu.sem_alloc : memref<!tpu.dma_semaphore, #tpu.memory_space<semaphore_mem>>
        %c0_i32_57 = arith.constant 0 : i32
        %c0_i32_58 = arith.constant 0 : i32
        %141 = tpu.memref_slice %arg2[%139, %c0_i32_57, %c0_i32_58] : memref<2x8x128xf32, #tpu.memory_space<any>> -> memref<2x8x128xf32, #tpu.memory_space<any>>
        tpu.enqueue_dma source(%141 : memref<2x8x128xf32, #tpu.memory_space<any>>) target(%arg14 : memref<2x8x128xf32, #tpu.memory_space<vmem>>) target_semaphore(%140 : memref<!tpu.dma_semaphore, #tpu.memory_space<semaphore_mem>>)
        %c0_i32_59 = arith.constant 0 : i32
        %c0_i32_60 = arith.constant 0 : i32
        %142 = tpu.memref_slice %arg2[%139, %c0_i32_59, %c0_i32_60] : memref<2x8x128xf32, #tpu.memory_space<any>> -> memref<2x8x128xf32, #tpu.memory_space<any>>
        tpu.wait_dma2 semaphore(%140 : memref<!tpu.dma_semaphore, #tpu.memory_space<semaphore_mem>>) src(%142 : memref<2x8x128xf32, #tpu.memory_space<any>>) dst(%arg14 : memref<2x8x128xf32, #tpu.memory_space<vmem>>)
        tpu.yield
      }) : () -> ()
    } else {
    }
    %c0 = arith.constant 0 : index
    %c0_1 = arith.constant 0 : index
    %c0_2 = arith.constant 0 : index
    %3 = vector.load %arg14[%c0, %c0_1, %c0_2] : memref<2x8x128xf32, #tpu.memory_space<vmem>>, vector<2x8x128xf32>
    %4 = vector.shape_cast %3 : vector<2x8x128xf32> to vector<16x128xf32>
    %5 = arith.truncf %4 : vector<16x128xf32> to vector<16x128xbf16>
    %c0_3 = arith.constant 0 : index
    %c0_4 = arith.constant 0 : index
    %c0_5 = arith.constant 0 : index
    %6 = vector.load %arg3[%c0_3, %c0_4, %c0_5] : memref<1x128x384xbf16, #tpu.memory_space<vmem>>, vector<1x128x384xbf16>
    %7 = vector.shape_cast %6 : vector<1x128x384xbf16> to vector<128x384xbf16>
    %cst = arith.constant dense<0.000000e+00> : vector<16x384xf32>
    %8 = tpu.matmul %5, %7, %cst {dimension_numbers = #tpu.dot_dimension_numbers<[1], [0], [0], [1], [0, 0, 1, 1], [], []>} : vector<16x128xbf16>, vector<128x384xbf16>, vector<16x384xf32> -> vector<16x384xf32>
    %9 = vector.extract_strided_slice %8 {offsets = [0, 0], sizes = [16, 32], strides = [1, 1]} : vector<16x384xf32> to vector<16x32xf32>
    %10 = vector.shape_cast %9 : vector<16x32xf32> to vector<2x8x32xf32>
    %11 = vector.extract_strided_slice %8 {offsets = [0, 32], sizes = [16, 32], strides = [1, 1]} : vector<16x384xf32> to vector<16x32xf32>
    %12 = vector.shape_cast %11 : vector<16x32xf32> to vector<2x8x32xf32>
    %13 = vector.extract_strided_slice %8 {offsets = [0, 64], sizes = [16, 32], strides = [1, 1]} : vector<16x384xf32> to vector<16x32xf32>
    %14 = vector.shape_cast %13 : vector<16x32xf32> to vector<2x8x32xf32>
    %15 = vector.extract_strided_slice %8 {offsets = [0, 96], sizes = [16, 32], strides = [1, 1]} : vector<16x384xf32> to vector<16x32xf32>
    %16 = vector.shape_cast %15 : vector<16x32xf32> to vector<2x8x32xf32>
    %17 = tpu.concatenate %10, %12, %14, %16 in 0 : vector<2x8x32xf32>, vector<2x8x32xf32>, vector<2x8x32xf32>, vector<2x8x32xf32> -> vector<8x8x32xf32>
    %18 = arith.truncf %17 : vector<8x8x32xf32> to vector<8x8x32xbf16>
    %19 = vector.extract_strided_slice %8 {offsets = [0, 128], sizes = [16, 32], strides = [1, 1]} : vector<16x384xf32> to vector<16x32xf32>
    %20 = vector.shape_cast %19 : vector<16x32xf32> to vector<2x8x32xf32>
    %21 = vector.extract_strided_slice %8 {offsets = [0, 160], sizes = [16, 32], strides = [1, 1]} : vector<16x384xf32> to vector<16x32xf32>
    %22 = vector.shape_cast %21 : vector<16x32xf32> to vector<2x8x32xf32>
    %23 = vector.extract_strided_slice %8 {offsets = [0, 192], sizes = [16, 32], strides = [1, 1]} : vector<16x384xf32> to vector<16x32xf32>
    %24 = vector.shape_cast %23 : vector<16x32xf32> to vector<2x8x32xf32>
    %25 = vector.extract_strided_slice %8 {offsets = [0, 224], sizes = [16, 32], strides = [1, 1]} : vector<16x384xf32> to vector<16x32xf32>
    %26 = vector.shape_cast %25 : vector<16x32xf32> to vector<2x8x32xf32>
    %27 = tpu.concatenate %20, %22, %24, %26 in 0 : vector<2x8x32xf32>, vector<2x8x32xf32>, vector<2x8x32xf32>, vector<2x8x32xf32> -> vector<8x8x32xf32>
    %28 = arith.truncf %27 : vector<8x8x32xf32> to vector<8x8x32xbf16>
    %29 = vector.extract_strided_slice %8 {offsets = [0, 256], sizes = [16, 32], strides = [1, 1]} : vector<16x384xf32> to vector<16x32xf32>
    %30 = vector.shape_cast %29 : vector<16x32xf32> to vector<2x8x32xf32>
    %31 = vector.extract_strided_slice %8 {offsets = [0, 288], sizes = [16, 32], strides = [1, 1]} : vector<16x384xf32> to vector<16x32xf32>
    %32 = vector.shape_cast %31 : vector<16x32xf32> to vector<2x8x32xf32>
    %33 = vector.extract_strided_slice %8 {offsets = [0, 320], sizes = [16, 32], strides = [1, 1]} : vector<16x384xf32> to vector<16x32xf32>
    %34 = vector.shape_cast %33 : vector<16x32xf32> to vector<2x8x32xf32>
    %35 = vector.extract_strided_slice %8 {offsets = [0, 352], sizes = [16, 32], strides = [1, 1]} : vector<16x384xf32> to vector<16x32xf32>
    %36 = vector.shape_cast %35 : vector<16x32xf32> to vector<2x8x32xf32>
    %37 = tpu.concatenate %30, %32, %34, %36 in 0 : vector<2x8x32xf32>, vector<2x8x32xf32>, vector<2x8x32xf32>, vector<2x8x32xf32> -> vector<8x8x32xf32>
    %38 = arith.truncf %37 : vector<8x8x32xf32> to vector<8x8x32xbf16>
    "tpu.trace_start"() <{level = 10 : i32, message = "bqd,bkd->bqk"}> : () -> ()
    %cst_6 = arith.constant dense<0.000000e+00> : vector<8x8x8xf32>
    %39 = tpu.matmul %18, %28, %cst_6 {dimension_numbers = #tpu.dot_dimension_numbers<[2], [2], [1], [1], [0, 0, 0, 1, 1, 1], [0], [0]>} : vector<8x8x32xbf16>, vector<8x8x32xbf16>, vector<8x8x8xf32> -> vector<8x8x8xf32>
    "tpu.trace_stop"() : () -> ()
    %cst_7 = arith.constant dense<0xFF800000> : vector<8x8xf32>
    %40 = vector.multi_reduction <maximumf>, %39, %cst_7 [2] : vector<8x8x8xf32> to vector<8x8xf32>
    %41 = vector.shape_cast %40 : vector<8x8xf32> to vector<8x8x1xf32>
    %42 = vector.broadcast %41 : vector<8x8x1xf32> to vector<8x8x8xf32>
    %43 = arith.subf %39, %42 : vector<8x8x8xf32>
    %44 = math.exp %43 : vector<8x8x8xf32>
    %cst_8 = arith.constant dense<0.000000e+00> : vector<8x8xf32>
    %45 = vector.multi_reduction <add>, %44, %cst_8 [2] : vector<8x8x8xf32> to vector<8x8xf32>
    %46 = vector.shape_cast %45 : vector<8x8xf32> to vector<8x8x1xf32>
    %47 = tpu.reciprocal %46 {approx = true} : vector<8x8x1xf32> -> vector<8x8x1xf32>
    %48 = vector.broadcast %47 : vector<8x8x1xf32> to vector<8x8x8xf32>
    %49 = arith.mulf %44, %48 : vector<8x8x8xf32>
    %50 = arith.truncf %49 : vector<8x8x8xf32> to vector<8x8x8xbf16>
    "tpu.trace_start"() <{level = 10 : i32, message = "bqk,bkd->bqd"}> : () -> ()
    %cst_9 = arith.constant dense<0.000000e+00> : vector<8x8x32xf32>
    %51 = tpu.matmul %50, %38, %cst_9 {dimension_numbers = #tpu.dot_dimension_numbers<[2], [1], [1], [2], [0, 0, 0, 1, 1, 2], [0], [0]>} : vector<8x8x8xbf16>, vector<8x8x32xbf16>, vector<8x8x32xf32> -> vector<8x8x32xf32>
    "tpu.trace_stop"() : () -> ()
    %52 = vector.extract_strided_slice %51 {offsets = [0, 0, 0], sizes = [2, 8, 32], strides = [1, 1, 1]} : vector<8x8x32xf32> to vector<2x8x32xf32>
    %53 = vector.shape_cast %52 : vector<2x8x32xf32> to vector<16x32xf32>
    %54 = vector.extract_strided_slice %51 {offsets = [2, 0, 0], sizes = [2, 8, 32], strides = [1, 1, 1]} : vector<8x8x32xf32> to vector<2x8x32xf32>
    %55 = vector.shape_cast %54 : vector<2x8x32xf32> to vector<16x32xf32>
    %56 = vector.extract_strided_slice %51 {offsets = [4, 0, 0], sizes = [2, 8, 32], strides = [1, 1, 1]} : vector<8x8x32xf32> to vector<2x8x32xf32>
    %57 = vector.shape_cast %56 : vector<2x8x32xf32> to vector<16x32xf32>
    %58 = vector.extract_strided_slice %51 {offsets = [6, 0, 0], sizes = [2, 8, 32], strides = [1, 1, 1]} : vector<8x8x32xf32> to vector<2x8x32xf32>
    %59 = vector.shape_cast %58 : vector<2x8x32xf32> to vector<16x32xf32>
    %60 = tpu.concatenate %53, %55, %57, %59 in 1 : vector<16x32xf32>, vector<16x32xf32>, vector<16x32xf32>, vector<16x32xf32> -> vector<16x128xf32>
    %61 = arith.truncf %60 : vector<16x128xf32> to vector<16x128xbf16>
    %c0_10 = arith.constant 0 : index
    %c0_11 = arith.constant 0 : index
    %c0_12 = arith.constant 0 : index
    %62 = vector.load %arg4[%c0_10, %c0_11, %c0_12] : memref<1x128x128xbf16, #tpu.memory_space<vmem>>, vector<1x128x128xbf16>
    %63 = vector.shape_cast %62 : vector<1x128x128xbf16> to vector<128x128xbf16>
    %cst_13 = arith.constant dense<0.000000e+00> : vector<16x128xf32>
    %64 = tpu.matmul %61, %63, %cst_13 {dimension_numbers = #tpu.dot_dimension_numbers<[1], [0], [0], [1], [0, 0, 1, 1], [], []>} : vector<16x128xbf16>, vector<128x128xbf16>, vector<16x128xf32> -> vector<16x128xf32>
    %c0_14 = arith.constant 0 : index
    %c0_15 = arith.constant 0 : index
    %c0_16 = arith.constant 0 : index
    %65 = vector.load %arg5[%c0_14, %c0_15, %c0_16] : memref<1x1x128xf32, #tpu.memory_space<vmem>>, vector<1x1x128xf32>
    %66 = vector.shape_cast %65 : vector<1x1x128xf32> to vector<1x128xf32>
    %67 = vector.broadcast %66 : vector<1x128xf32> to vector<16x128xf32>
    %68 = arith.addf %64, %67 : vector<16x128xf32>
    %69 = arith.addf %4, %68 : vector<16x128xf32>
    %c0_17 = arith.constant 0 : index
    %c0_18 = arith.constant 0 : index
    %c0_19 = arith.constant 0 : index
    %70 = vector.load %arg10[%c0_17, %c0_18, %c0_19] : memref<1x1x128xf32, #tpu.memory_space<vmem>>, vector<1x1x128xf32>
    %71 = vector.shape_cast %70 : vector<1x1x128xf32> to vector<1x128xf32>
    %c0_20 = arith.constant 0 : index
    %c0_21 = arith.constant 0 : index
    %c0_22 = arith.constant 0 : index
    %72 = vector.load %arg11[%c0_20, %c0_21, %c0_22] : memref<1x1x128xf32, #tpu.memory_space<vmem>>, vector<1x1x128xf32>
    %73 = vector.shape_cast %72 : vector<1x1x128xf32> to vector<1x128xf32>
    %cst_23 = arith.constant dense<0.000000e+00> : vector<16xf32>
    %74 = vector.multi_reduction <add>, %69, %cst_23 [1] : vector<16x128xf32> to vector<16xf32>
    %75 = vector.shape_cast %74 : vector<16xf32> to vector<16x1xf32>
    %cst_24 = arith.constant 1.280000e+02 : f32
    %76 = vector.broadcast %cst_24 : f32 to vector<16x1xf32>
    %77 = arith.divf %75, %76 : vector<16x1xf32>
    %78 = vector.broadcast %77 : vector<16x1xf32> to vector<16x128xf32>
    %79 = arith.subf %69, %78 : vector<16x128xf32>
    %80 = arith.mulf %79, %79 : vector<16x128xf32>
    %cst_25 = arith.constant dense<0.000000e+00> : vector<16xf32>
    %81 = vector.multi_reduction <add>, %80, %cst_25 [1] : vector<16x128xf32> to vector<16xf32>
    %82 = vector.shape_cast %81 : vector<16xf32> to vector<16x1xf32>
    %cst_26 = arith.constant 1.280000e+02 : f32
    %83 = vector.broadcast %cst_26 : f32 to vector<16x1xf32>
    %84 = arith.divf %82, %83 : vector<16x1xf32>
    %cst_27 = arith.constant 9.99999997E-7 : f32
    %85 = vector.broadcast %cst_27 : f32 to vector<16x1xf32>
    %86 = arith.addf %84, %85 : vector<16x1xf32>
    %87 = math.rsqrt %86 : vector<16x1xf32>
    %88 = vector.broadcast %87 : vector<16x1xf32> to vector<16x128xf32>
    %89 = arith.mulf %79, %88 : vector<16x128xf32>
    %90 = vector.broadcast %71 : vector<1x128xf32> to vector<16x128xf32>
    %91 = arith.mulf %90, %89 : vector<16x128xf32>
    %92 = vector.broadcast %73 : vector<1x128xf32> to vector<16x128xf32>
    %93 = arith.addf %91, %92 : vector<16x128xf32>
    %94 = arith.truncf %93 : vector<16x128xf32> to vector<16x128xbf16>
    %c0_28 = arith.constant 0 : index
    %c0_29 = arith.constant 0 : index
    %c0_30 = arith.constant 0 : index
    %95 = vector.load %arg6[%c0_28, %c0_29, %c0_30] : memref<1x128x256xbf16, #tpu.memory_space<vmem>>, vector<1x128x256xbf16>
    %96 = vector.shape_cast %95 : vector<1x128x256xbf16> to vector<128x256xbf16>
    %cst_31 = arith.constant dense<0.000000e+00> : vector<16x256xf32>
    %97 = tpu.matmul %94, %96, %cst_31 {dimension_numbers = #tpu.dot_dimension_numbers<[1], [0], [0], [1], [0, 0, 1, 1], [], []>} : vector<16x128xbf16>, vector<128x256xbf16>, vector<16x256xf32> -> vector<16x256xf32>
    %c0_32 = arith.constant 0 : index
    %c0_33 = arith.constant 0 : index
    %c0_34 = arith.constant 0 : index
    %98 = vector.load %arg7[%c0_32, %c0_33, %c0_34] : memref<1x1x256xf32, #tpu.memory_space<vmem>>, vector<1x1x256xf32>
    %99 = vector.shape_cast %98 : vector<1x1x256xf32> to vector<1x256xf32>
    %100 = vector.broadcast %99 : vector<1x256xf32> to vector<16x256xf32>
    %101 = arith.addf %97, %100 : vector<16x256xf32>
    %cst_35 = arith.constant 0.000000e+00 : f32
    %102 = vector.broadcast %cst_35 : f32 to vector<16x256xf32>
    %103 = arith.maximumf %101, %102 : vector<16x256xf32>
    %104 = arith.truncf %103 : vector<16x256xf32> to vector<16x256xbf16>
    %c0_36 = arith.constant 0 : index
    %c0_37 = arith.constant 0 : index
    %c0_38 = arith.constant 0 : index
    %105 = vector.load %arg8[%c0_36, %c0_37, %c0_38] : memref<1x256x128xbf16, #tpu.memory_space<vmem>>, vector<1x256x128xbf16>
    %106 = vector.shape_cast %105 : vector<1x256x128xbf16> to vector<256x128xbf16>
    %cst_39 = arith.constant dense<0.000000e+00> : vector<16x128xf32>
    %107 = tpu.matmul %104, %106, %cst_39 {dimension_numbers = #tpu.dot_dimension_numbers<[1], [0], [0], [1], [0, 0, 1, 1], [], []>} : vector<16x256xbf16>, vector<256x128xbf16>, vector<16x128xf32> -> vector<16x128xf32>
    %c0_40 = arith.constant 0 : index
    %c0_41 = arith.constant 0 : index
    %c0_42 = arith.constant 0 : index
    %108 = vector.load %arg9[%c0_40, %c0_41, %c0_42] : memref<1x1x128xf32, #tpu.memory_space<vmem>>, vector<1x1x128xf32>
    %109 = vector.shape_cast %108 : vector<1x1x128xf32> to vector<1x128xf32>
    %110 = vector.broadcast %109 : vector<1x128xf32> to vector<16x128xf32>
    %111 = arith.addf %107, %110 : vector<16x128xf32>
    %112 = arith.addf %93, %111 : vector<16x128xf32>
    %c0_43 = arith.constant 0 : index
    %c0_44 = arith.constant 0 : index
    %c0_45 = arith.constant 0 : index
    %113 = vector.load %arg12[%c0_43, %c0_44, %c0_45] : memref<1x1x128xf32, #tpu.memory_space<vmem>>, vector<1x1x128xf32>
    %114 = vector.shape_cast %113 : vector<1x1x128xf32> to vector<1x128xf32>
    %c0_46 = arith.constant 0 : index
    %c0_47 = arith.constant 0 : index
    %c0_48 = arith.constant 0 : index
    %115 = vector.load %arg13[%c0_46, %c0_47, %c0_48] : memref<1x1x128xf32, #tpu.memory_space<vmem>>, vector<1x1x128xf32>
    %116 = vector.shape_cast %115 : vector<1x1x128xf32> to vector<1x128xf32>
    %cst_49 = arith.constant dense<0.000000e+00> : vector<16xf32>
    %117 = vector.multi_reduction <add>, %112, %cst_49 [1] : vector<16x128xf32> to vector<16xf32>
    %118 = vector.shape_cast %117 : vector<16xf32> to vector<16x1xf32>
    %cst_50 = arith.constant 1.280000e+02 : f32
    %119 = vector.broadcast %cst_50 : f32 to vector<16x1xf32>
    %120 = arith.divf %118, %119 : vector<16x1xf32>
    %121 = vector.broadcast %120 : vector<16x1xf32> to vector<16x128xf32>
    %122 = arith.subf %112, %121 : vector<16x128xf32>
    %123 = arith.mulf %122, %122 : vector<16x128xf32>
    %cst_51 = arith.constant dense<0.000000e+00> : vector<16xf32>
    %124 = vector.multi_reduction <add>, %123, %cst_51 [1] : vector<16x128xf32> to vector<16xf32>
    %125 = vector.shape_cast %124 : vector<16xf32> to vector<16x1xf32>
    %cst_52 = arith.constant 1.280000e+02 : f32
    %126 = vector.broadcast %cst_52 : f32 to vector<16x1xf32>
    %127 = arith.divf %125, %126 : vector<16x1xf32>
    %cst_53 = arith.constant 9.99999997E-7 : f32
    %128 = vector.broadcast %cst_53 : f32 to vector<16x1xf32>
    %129 = arith.addf %127, %128 : vector<16x1xf32>
    %130 = math.rsqrt %129 : vector<16x1xf32>
    %131 = vector.broadcast %130 : vector<16x1xf32> to vector<16x128xf32>
    %132 = arith.mulf %122, %131 : vector<16x128xf32>
    %133 = vector.broadcast %114 : vector<1x128xf32> to vector<16x128xf32>
    %134 = arith.mulf %133, %132 : vector<16x128xf32>
    %135 = vector.broadcast %116 : vector<1x128xf32> to vector<16x128xf32>
    %136 = arith.addf %134, %135 : vector<16x128xf32>
    %137 = vector.shape_cast %136 : vector<16x128xf32> to vector<2x8x128xf32>
    %c0_54 = arith.constant 0 : index
    %c0_55 = arith.constant 0 : index
    %c0_56 = arith.constant 0 : index
    %138 = vector.load %arg14[%c0_54, %c0_55, %c0_56] : memref<2x8x128xf32, #tpu.memory_space<vmem>>, vector<2x8x128xf32>
    tpu.vector_store %arg14[%c0_54, %c0_55, %c0_56], %137 {strides = array<i32>} : memref<2x8x128xf32, #tpu.memory_space<vmem>>, vector<2x8x128xf32>,
    return
  }
  func.func @transform_1(%arg0: i32, %arg1: i32) -> (i32, i32, i32) {
    %c0_i32 = arith.constant 0 : i32
    %c0_i32_0 = arith.constant 0 : i32
    %c0_i32_1 = arith.constant 0 : i32
    return %arg1, %c0_i32, %c0_i32_0 : i32, i32, i32
  }
  func.func @transform_2(%arg0: i32, %arg1: i32) -> (i32, i32, i32) {
    %c0_i32 = arith.constant 0 : i32
    %c0_i32_0 = arith.constant 0 : i32
    %c0_i32_1 = arith.constant 0 : i32
    return %arg1, %c0_i32, %c0_i32_0 : i32, i32, i32
  }
  func.func @transform_3(%arg0: i32, %arg1: i32) -> (i32, i32, i32) {
    %c0_i32 = arith.constant 0 : i32
    %c0_i32_0 = arith.constant 0 : i32
    %c0_i32_1 = arith.constant 0 : i32
    return %arg1, %c0_i32, %c0_i32_0 : i32, i32, i32
  }
  func.func @transform_4(%arg0: i32, %arg1: i32) -> (i32, i32, i32) {
    %c0_i32 = arith.constant 0 : i32
    %c0_i32_0 = arith.constant 0 : i32
    %c0_i32_1 = arith.constant 0 : i32
    return %arg1, %c0_i32, %c0_i32_0 : i32, i32, i32
  }
  func.func @transform_5(%arg0: i32, %arg1: i32) -> (i32, i32, i32) {
    %c0_i32 = arith.constant 0 : i32
    %c0_i32_0 = arith.constant 0 : i32
    %c0_i32_1 = arith.constant 0 : i32
    return %arg1, %c0_i32, %c0_i32_0 : i32, i32, i32
  }
  func.func @transform_6(%arg0: i32, %arg1: i32) -> (i32, i32, i32) {
    %c0_i32 = arith.constant 0 : i32
    %c0_i32_0 = arith.constant 0 : i32
    %c0_i32_1 = arith.constant 0 : i32
    return %arg1, %c0_i32, %c0_i32_0 : i32, i32, i32
  }
  func.func @transform_7(%arg0: i32, %arg1: i32) -> (i32, i32, i32) {
    %c0_i32 = arith.constant 0 : i32
    %c0_i32_0 = arith.constant 0 : i32
    %c0_i32_1 = arith.constant 0 : i32
    return %arg1, %c0_i32, %c0_i32_0 : i32, i32, i32
  }
  func.func @transform_8(%arg0: i32, %arg1: i32) -> (i32, i32, i32) {
    %c0_i32 = arith.constant 0 : i32
    %c0_i32_0 = arith.constant 0 : i32
    %c0_i32_1 = arith.constant 0 : i32
    return %arg1, %c0_i32, %c0_i32_0 : i32, i32, i32
  }
  func.func @transform_9(%arg0: i32, %arg1: i32) -> (i32, i32, i32) {
    %c0_i32 = arith.constant 0 : i32
    %c0_i32_0 = arith.constant 0 : i32
    %c0_i32_1 = arith.constant 0 : i32
    return %arg1, %c0_i32, %c0_i32_0 : i32, i32, i32
  }
  func.func @transform_10(%arg0: i32, %arg1: i32) -> (i32, i32, i32) {
    %c0_i32 = arith.constant 0 : i32
    %c0_i32_0 = arith.constant 0 : i32
    %c0_i32_1 = arith.constant 0 : i32
    return %arg1, %c0_i32, %c0_i32_0 : i32, i32, i32
  }
  func.func @transform_11(%arg0: i32, %arg1: i32) -> (i32, i32, i32) {
    %c0_i32 = arith.constant 0 : i32
    %c0_i32_0 = arith.constant 0 : i32
    %c0_i32_1 = arith.constant 0 : i32
    return %arg1, %c0_i32, %c0_i32_0 : i32, i32, i32
  }
  func.func @transform_12(%arg0: i32, %arg1: i32) -> (i32, i32, i32) {
    %c0_i32 = arith.constant 0 : i32
    %c0_i32_0 = arith.constant 0 : i32
    %c0_i32_1 = arith.constant 0 : i32
    return %arg0, %c0_i32, %c0_i32_0 : i32, i32, i32
  }
}

</mosaic_0001>

<bundles_post_ra>
// kernel: tpu_custom_call.1
= control target key start
LH: loop header
LB: loop body
LE: loop exit
PB: predicated region body
PF: predicated region fallthrough
CT: control target
= control target key end

     0   :  { %s4119_s0 = inlined_call_operand.hbm [shape: f32[2,8,128], index: 0, kind: input, shape index: {}]   ;;  %s4120_s1 = inlined_call_operand.hbm [shape: bf16[2,128,384], index: 1, kind: input, shape index: {}]   ;;  %s4121_s2 = inlined_call_operand.hbm [shape: bf16[2,128,128], index: 2, kind: input, shape index: {}]   ;;  %s4122_s3 = inlined_call_operand.vmem [shape: f32[2,1,128], index: 3, kind: input, shape index: {}]   ;;  %s4123_s4 = inlined_call_operand.hbm [shape: bf16[2,128,256], index: 4, kind: input, shape index: {}]   ;;  %s4124_s5 = inlined_call_operand.vmem [shape: f32[2,1,256], index: 5, kind: input, shape index: {}]   ;;  %s4125_s6 = inlined_call_operand.hbm [shape: bf16[2,256,128], index: 6, kind: input, shape index: {}]   ;;  %s4126_s7 = inlined_call_operand.vmem [shape: f32[2,1,128], index: 7, kind: input, shape index: {}]   ;;  %s4127_s8 = inlined_call_operand.vmem [shape: f32[2,1,128], index: 8, kind: input, shape index: {}]   ;;  %s4128_s9 = inlined_call_operand.vmem [shape: f32[2,1,128], index: 9, kind: input, shape index: {}]   ;;  %s4129_s10 = inlined_call_operand.vmem [shape: f32[2,1,128], index: 10, kind: input, shape index: {}]   ;;  %s4130_s11 = inlined_call_operand.vmem [shape: f32[2,1,128], index: 11, kind: input, shape index: {}]   ;;  %s4131_s12 = inlined_call_operand.hbm [shape: f32[2,8,128], index: 12, kind: output, shape index: {}]  }
   0x1   :  { %4141 = sst [smem:[#allocation26_spill]] %s4119_s0 }
   0x2   :  { %4142 = sst [smem:[#allocation27_spill]] %s4120_s1 }
   0x3   :  { %4143 = sst [smem:[#allocation28_spill]] %s4121_s2 }
   0x4   :  { %4144 = sst [smem:[#allocation29_spill]] %s4123_s4 }
   0x5   :  { %4145 = sst [smem:[#allocation30_spill]] %s4125_s6 }
   0x6   :  { %4146 = sst [smem:[#allocation31_spill]] %s4130_s11 }
   0x7   :  { %4147 = sst [smem:[#allocation32_spill]] %s4131_s12 }
   0x8   :  { %17 = vsyncpa [#allocation3], 0 }
   0x9   :  { %19 = vsyncpa [#allocation3 + $0x1], 0 }
   0xa   :  { %20 = vsyncpa [#allocation6], 0 }
   0xb   :  { %22 = vsyncpa [#allocation6 + $0x1], 0 }
   0xc   :  { %23 = vsyncpa [#allocation9], 0 }
   0xd   :  { %25 = vsyncpa [#allocation9 + $0x1], 0 }
   0xe   :  { %26 = vsyncpa [#allocation4], 0  ;;  %s3502_s21 = smov 0   ;;  %s3504_s22 = smov 0  }
   0xf   :  { %s3506_s23 = smov 0   ;;  %s3508_s24 = smov 0  }
  0x10   :  { %s3510_s25 = smov 0   ;;  %s3512_s26 = smov 0  }
  0x11 LB: > { %4148 = sst [smem:[#allocation21_spill]] %s3403_s23  ;;  %s3531_s27 = sadd.s32 4294967295, %s3415_s26   ;;  %s3415_s26 = sphi %s3512_s26, %s32_s26   ;;  %s3411_s25 = sphi %s3510_s25, %s4178_s25   ;;  %s3407_s24 = sphi %s3508_s24, %s4177_s24   ;;  %s3403_s23 = sphi %s3506_s23, %s4176_s23   ;;  %s3399_s22 = sphi %s3504_s22, %s4180_s22   ;;  %s3395_s21 = sphi %s3502_s21, %s4179_s21  }
  0x12   : > { %4149 = sst [smem:[#allocation22_spill]] %s3411_s25  ;;  %s41_s28 = sadd.s32 1, %s3411_s25 }
  0x13   : > { %4150 = sst [smem:[#allocation23_spill]] %s3415_s26  ;;  %p42_p0 = scmp.ge.s32.totalorder %s41_s28, 2 }
  0x14   : > { %s51_s29 = sadd.s32 1, %s3403_s23  ;;  %p58_p1 = scmp.ne.s32.totalorder %s3403_s23, %s3399_s22 }
  0x15   : > { %p59_p2 = scmp.eq.s32.totalorder %s3415_s26, 0  ;;  %s4182_s28 = smov (%p42_p0, %s41_s28), 0 }
  0x16   : > { %4151 = sst [smem:[#allocation24_spill]] %s4182_s28  ;;  %p64_p4 = scmp.ne.s32.totalorder %s3399_s22, %s3395_s21 }
  0x17   : > { %p60_p3 = por %p59_p2, %p58_p1  ;;  %s48_s30 = ssub.s32 %s3411_s25, %s4182_s28 }
  0x18   : > { %p65_p5 = scmp.eq.s32.totalorder %s3531_s27, 0  ;;  %p49_p6 = scmp.eq.s32.totalorder %s48_s30, 0 }
  0x19   : > { %p2941_p8 = scmp.lt.s32.totalorder %s3415_s26, 2  ;;  %s3553_s15 = sand.u32 1, %s3403_s23  }
  0x1a   : > { %p3544_p7 = por %p65_p5, %p64_p4  ;;  %s395_s17 = sand.u32 1, %s3415_s26  }
  0x1b   : > { %s3550_s14 = scalar_select %p49_p6, %s3403_s23, %s51_s29  }
  0x1c   : > { %s4152_s13 = scalar_select %p3544_p7, 1, 0 }
  0x1d   : > { %4153 = sst [smem:[#allocation25_spill]] %s3550_s14  ;;  %p3555_p9 = pnand %p2941_p8, %p60_p3 }
  0x1e   : > { %s2597_s18 = sshll.u32 %s3553_s15, 6  ;;  %s2702_s19 = sshll.u32 %s3411_s25, 10 }
  0x1f   : > { %s4155_s2 = sld [smem:[#allocation28_spill]]  ;;  %s399_s29 = scalar_lea.vmem [#allocation5], %s2597_s18 }
  0x20   : > { %s406_s28 = sshll.u32 %s399_s29, 4  ;;  %s3570_s14 = scalar_lea.sflag [#allocation6], %s395_s17  ;;  %s3567_s28 = int_to_ptr.vmem [resolvable:$true] %s406_s28 }
  0x21   : > { %p3576_p12 = pneg %p3555_p9 }
  0x25   : > { %s3565_s30 = scalar_lea.hbm %s4155_s2, %s2702_s19  ;;  %s3188_s18 = scalar_lea.hbm %s4155_s2, 2048 }
  0x26   : > { %s3183_s23 = scalar_lea.hbm %s3565_s30, 1024  ;;  %p3189_p1 = scmp.lt.u32.totalorder %s3565_s30, %s4155_s2 }
  0x27   : > { %p3184_p11 = scmp.ne.s32.totalorder %s3565_s30, %s3183_s23  ;;  %p3190_p2 = scmp.lt.u32.totalorder %s3188_s18, %s3183_s23 }
  0x28   : > { %p3192_p4 = scmp.lt.u32.totalorder %s3183_s23, %s3565_s30 }
  0x29   : > { %p3186_p13 = pnand %p3576_p12, %p3184_p11  ;;  %p3191_p3 = por %p3190_p2, %p3189_p1 }
  0x2b   : > { %p3187_p0 = pneg %p3186_p13  ;;  %p3193_p5 = por %p3192_p4, %p3191_p3 }
  0x2d   : > { %p3194_p6 = pnand %p3193_p5, %p3187_p0 }
  0x2f   : > { %3197 = shalt.err (!%p3194_p6)
}
  0x30   : > { %s3198_s17 = scalar_lea.vmem %s3567_s28, 1024  ;;  %s3417_s19 = smov [#allocation5]  }
  0x31   : > { %p3199_p8 = scmp.ne.s32.totalorder %s3567_s28, %s3198_s17  ;;  %s3203_s20 = sshll.u32 %s3417_s19, 4  ;;  %s3204_s20 = int_to_ptr.vmem [resolvable:$false] %s3203_s20 }
  0x32   : > { %s3205_s21 = scalar_lea.vmem %s3204_s20, 2048  ;;  %p3206_p10 = scmp.lt.s32.totalorder %s3567_s28, %s3204_s20 }
  0x33   : > { %p3201_p11 = pnand %p3199_p8, %p3576_p12  ;;  %p3207_p7 = scmp.lt.s32.totalorder %s3205_s21, %s3198_s17 }
  0x35   : > { %p3202_p13 = pneg %p3201_p11  ;;  %p3208_p1 = por %p3207_p7, %p3206_p10 }
  0x37   : > { %p3209_p2 = pnand %p3208_p1, %p3202_p13 }
  0x39   : > { %3212 = shalt.err (!%p3209_p2)
}
  0x3a   : > { %s4137_s23 = smov 64   ;;  %s4138_s18 = smov 4  }
  0x3b   : > { %2934 = dma.hbm_to_vmem [thread:$0]  (!%p3555_p9), %s3565_s30, 1024, %s3567_s28, %s3570_s14, %s4137_s23, %s4137_s23, %s4138_s18  }
  0x3c   : > { %p499_p7 = scmp.lt.s32.totalorder %s3415_s26, 3  ;;  %p4157_p10 = scmp.ge.s32.totalorder %s3415_s26, 1 }
  0x3d   : > { %s2913_s17 = smul.u32 192, %s3553_s15  ;;  %s4159_s1 = sld [smem:[#allocation27_spill]] }
  0x3e   : > { %p3606_p0 = pnand %p4157_p10, %p499_p7  ;;  %s2914_s19 = smul.u32 3072, %s3411_s25 }
  0x3f   : > { %s378_s0 = scalar_lea.vmem [#allocation2], %s2913_s17  ;;  %s2600_s28 = sshll.u32 %s3553_s15, 7 }
  0x40   : > { %s4158_s29 = scalar_select %p3606_p0, 1, 0 }
  0x41   : > { %s385_s11 = sshll.u32 %s378_s0, 4  ;;  %s375_s30 = scalar_lea.sflag [#allocation3], %s3553_s15  ;;  %s3617_s11 = int_to_ptr.vmem [resolvable:$true] %s385_s11 }
  0x43   : > { %s3615_s2 = scalar_lea.hbm %s4159_s1, %s2914_s19  ;;  %s3218_s19 = scalar_lea.hbm %s4159_s1, 6144 }
  0x44   : > { %s3213_s23 = scalar_lea.hbm %s3615_s2, 3072  ;;  %p3219_p6 = scmp.lt.u32.totalorder %s3615_s2, %s4159_s1 }
  0x45   : > { %p3214_p3 = scmp.ne.s32.totalorder %s3615_s2, %s3213_s23  ;;  %p3220_p8 = scmp.lt.u32.totalorder %s3218_s19, %s3213_s23 }
  0x46   : > { %p3222_p13 = scmp.lt.u32.totalorder %s3213_s23, %s3615_s2 }
  0x47   : > { %p3216_p4 = pnand %p3214_p3, %p3576_p12  ;;  %p3221_p11 = por %p3220_p8, %p3219_p6 }
  0x49   : > { %p3217_p5 = pneg %p3216_p4  ;;  %p3223_p1 = por %p3222_p13, %p3221_p11 }
  0x4b   : > { %p3224_p2 = pnand %p3223_p1, %p3217_p5 }
  0x4d   : > { %3227 = shalt.err (!%p3224_p2)
}
  0x4e   : > { %s3228_s0 = scalar_lea.vmem %s3617_s11, 3072  ;;  %s3420_s26 = smov [#allocation2]  }
  0x4f   : > { %p3229_p7 = scmp.ne.s32.totalorder %s3617_s11, %s3228_s0  ;;  %s3233_s18 = sshll.u32 %s3420_s26, 4  ;;  %s3234_s18 = int_to_ptr.vmem [resolvable:$false] %s3233_s18 }
  0x50   : > { %s3235_s17 = scalar_lea.vmem %s3234_s18, 6144  ;;  %p3236_p4 = scmp.lt.s32.totalorder %s3617_s11, %s3234_s18 }
  0x51   : > { %p3231_p10 = pnand %p3229_p7, %p3576_p12  ;;  %p3237_p0 = scmp.lt.s32.totalorder %s3235_s17, %s3228_s0 }
  0x53   : > { %p3232_p3 = pneg %p3231_p10  ;;  %p3238_p6 = por %p3237_p0, %p3236_p4 }
  0x55   : > { %p3239_p8 = pnand %p3238_p6, %p3232_p3 }
  0x57   : > { %3242 = shalt.err (!%p3239_p8)
}
  0x58   : > { %s3421_s23 = smov 192   ;;  %s3422_s19 = smov 12  }
  0x59   : > { %2931 = dma.hbm_to_vmem [thread:$0]  (!%p3555_p9), %s3615_s2, 3072, %s3617_s11, %s375_s30, %s3421_s23, %s3421_s23, %s3422_s19  }
  0x5a   : > { %s2703_s20 = sshll.u32 %s3411_s25, 11  ;;  %s4160_s4 = sld [smem:[#allocation29_spill]] }
  0x5b   : > { %s426_s18 = scalar_lea.vmem [#allocation7], %s2600_s28 }
  0x5c   : > { %s433_s17 = sshll.u32 %s426_s18, 4  ;;  %s3654_s17 = int_to_ptr.vmem [resolvable:$true] %s433_s17 }
  0x60   : > { %s3650_s26 = scalar_lea.hbm %s4160_s4, %s2703_s20  ;;  %s3248_s30 = scalar_lea.hbm %s4160_s4, 4096 }
  0x61   : > { %s3243_s1 = scalar_lea.hbm %s3650_s26, 2048  ;;  %p3249_p13 = scmp.lt.u32.totalorder %s3650_s26, %s4160_s4 }
  0x62   : > { %p3244_p0 = scmp.ne.s32.totalorder %s3650_s26, %s3243_s1  ;;  %p3250_p1 = scmp.lt.u32.totalorder %s3248_s30, %s3243_s1 }
  0x63   : > { %p3252_p7 = scmp.lt.u32.totalorder %s3243_s1, %s3650_s26 }
  0x64   : > { %p3246_p5 = pnand %p3244_p0, %p3576_p12  ;;  %p3251_p2 = por %p3250_p1, %p3249_p13 }
  0x66   : > { %p3247_p11 = pneg %p3246_p5  ;;  %p3253_p10 = por %p3252_p7, %p3251_p2 }
  0x68   : > { %p3254_p3 = pnand %p3253_p10, %p3247_p11 }
  0x6a   : > { %3257 = shalt.err (!%p3254_p3)
}
  0x6b   : > { %s3258_s21 = scalar_lea.vmem %s3654_s17, 2048  ;;  %s3423_s0 = smov [#allocation7]  }
  0x6c   : > { %p3259_p4 = scmp.ne.s32.totalorder %s3654_s17, %s3258_s21  ;;  %s3263_s18 = sshll.u32 %s3423_s0, 4  ;;  %s3264_s18 = int_to_ptr.vmem [resolvable:$false] %s3263_s18 }
  0x6d   : > { %s3265_s2 = scalar_lea.vmem %s3264_s18, 4096  ;;  %p3266_p0 = scmp.lt.s32.totalorder %s3654_s17, %s3264_s18 }
  0x6e   : > { %p3261_p6 = pnand %p3259_p4, %p3576_p12  ;;  %p3267_p5 = scmp.lt.s32.totalorder %s3265_s2, %s3258_s21 }
  0x70   : > { %p3262_p8 = pneg %p3261_p6  ;;  %p3268_p13 = por %p3267_p5, %p3266_p0 }
  0x72   : > { %p3269_p1 = pnand %p3268_p13, %p3262_p8 }
  0x74   : > { %3272 = shalt.err (!%p3269_p1)
}
  0x75   : > { %s3424_s1 = smov 128   ;;  %s3425_s11 = smov 8  }
  0x76   : > { %2937 = dma.hbm_to_vmem [thread:$0]  (!%p3555_p9), %s3650_s26, 2048, %s3654_s17, %s3570_s14, %s3424_s1, %s3424_s1, %s3425_s11  }
  0x77   : > { %s4161_s6 = sld [smem:[#allocation30_spill]]  ;;  %s454_s21 = scalar_lea.vmem [#allocation8], %s2600_s28 }
  0x78   : > { %s461_s0 = sshll.u32 %s454_s21, 4  ;;  %s451_s18 = scalar_lea.sflag [#allocation9], %s3553_s15  ;;  %s3687_s0 = int_to_ptr.vmem [resolvable:$true] %s461_s0 }
  0x7d   : > { %s3683_s19 = scalar_lea.hbm %s4161_s6, %s2703_s20  ;;  %s3278_s20 = scalar_lea.hbm %s4161_s6, 4096 }
  0x7e   : > { %s3273_s2 = scalar_lea.hbm %s3683_s19, 2048  ;;  %p3279_p10 = scmp.lt.u32.totalorder %s3683_s19, %s4161_s6 }
  0x7f   : > { %p3274_p11 = scmp.ne.s32.totalorder %s3683_s19, %s3273_s2  ;;  %p3280_p3 = scmp.lt.u32.totalorder %s3278_s20, %s3273_s2 }
  0x80   : > { %p3282_p6 = scmp.lt.u32.totalorder %s3273_s2, %s3683_s19 }
  0x81   : > { %p3276_p2 = pnand %p3274_p11, %p3576_p12  ;;  %p3281_p4 = por %p3280_p3, %p3279_p10 }
  0x83   : > { %p3277_p7 = pneg %p3276_p2  ;;  %p3283_p8 = por %p3282_p6, %p3281_p4 }
  0x85   : > { %p3284_p0 = pnand %p3283_p8, %p3277_p7 }
  0x87   : > { %3287 = shalt.err (!%p3284_p0)
}
  0x88   : > { %s3288_s28 = scalar_lea.vmem %s3687_s0, 2048  ;;  %s3426_s11 = smov [#allocation8]  }
  0x89   : > { %p3289_p5 = scmp.ne.s32.totalorder %s3687_s0, %s3288_s28  ;;  %s3293_s30 = sshll.u32 %s3426_s11, 4  ;;  %s3294_s30 = int_to_ptr.vmem [resolvable:$false] %s3293_s30 }
  0x8a   : > { %s3295_s23 = scalar_lea.vmem %s3294_s30, 4096  ;;  %p3296_p11 = scmp.lt.s32.totalorder %s3687_s0, %s3294_s30 }
  0x8b   : > { %p3291_p13 = pnand %p3289_p5, %p3576_p12  ;;  %p3297_p2 = scmp.lt.s32.totalorder %s3295_s23, %s3288_s28 }
  0x8d   : > { %p3292_p1 = pneg %p3291_p13  ;;  %p3298_p10 = por %p3297_p2, %p3296_p11 }
  0x8f   : > { %p3299_p3 = pnand %p3298_p10, %p3292_p1 }
  0x91   : > { %3302 = shalt.err (!%p3299_p3)
}
  0x92   : > { %s4162_s21 = smov 4   ;;  %s4163_s2 = smov 64  }
  0x93   : > { %2940 = dma.hbm_to_vmem [thread:$0]  (!%p3555_p9), %s3683_s19, 2048, %s3687_s0, %s451_s18, %s4163_s2, %s4163_s2, %s4162_s21  }
  0x94   : > { %p4164_p12 = scmp.ne.s32.totalorder %s4158_s29, 0 }
  0x95   : > { %s505_s12 = sand.u32 (!%p4164_p12), 1, %s3399_s22   ;;  %p4165_p7 = scmp.ne.s32.totalorder (!%p4164_p12), %s4152_s13, 0 }
  0x96   : > { %503 = sbr.rel (%p4164_p12) target bundleno = 2810 (0xafa), region = 64  ;;  %s506_s26 = scalar_lea.sflag (!%p4164_p12), [#allocation3], %s505_s12 }
  0x97   : > { %s2915_s14 = smul.u32 (!%p4164_p12), 192, %s505_s12 }
  0x99   : > { %s3719_s20 = scalar_lea.vmem (!%p4164_p12), [#allocation2], %s2915_s14 }
  0x9d   : > { %3376 = dma.done.wait (%p4165_p7), %s506_s26, 3072  }
  0x9e   : > { %3378 = vsyncadd (%p4165_p7), %s506_s26, 4294964224  ;;  %s514_s15 = sand.u32 1, %s3531_s27   ;;  %s2607_s16 = sshll.u32 %s505_s12, 6 }
  0x9f   : > { %s515_s19 = scalar_lea.sflag [#allocation6], %s514_s15  ;;  %s3726_s0 = scalar_lea.vmem [#allocation5], %s2607_s16 }
  0xa0   : > { %3380 = dma.done.wait (%p4165_p7), %s515_s19, 3072  }
  0xa1   : > { %3382 = vsyncadd (%p4165_p7), %s515_s19, 4294964224  ;;  %s2608_s29 = sshll.u32 %s505_s12, 7  ;;  %s533_s17 = scalar_lea.sflag [#allocation9], %s505_s12 }
  0xa2   : > { %s3732_s18 = scalar_lea.vmem [#allocation7], %s2608_s29  ;;  %s3734_s1 = scalar_lea.vmem [#allocation8], %s2608_s29 }
  0xa3   : > { %3384 = dma.done.wait (%p4165_p7), %s533_s17, 2048  }
  0xa4   : > { %3386 = vsyncadd (%p4165_p7), %s533_s17, 4294965248  ;;  %p607_p9 = scmp.lt.s32.totalorder %s3407_s24, 1  ;;  %p2611_p4 = scmp.ne.s32.totalorder %s3407_s24, 0 }
  0xa6   : > { %s3742_s28 = scalar_select %p607_p9, %s3407_s24, 1 }
  0xa8   : > { %s2610_s21 = sshll.u32 %s3742_s28, 1  ;;  %s622_s30 = scalar_lea.vmem %s4128_s9, %s3742_s28 }
  0xa9   : > { %s3752_s12 = scalar_lea.vmem %s4124_s5, %s2610_s21  ;;  %s625_s6 = scalar_lea.vmem %s4129_s10, %s3742_s28 }
  0xaa   : > { %s4166_s21 = sld [smem:[#allocation31_spill]]  ;;  %634 = sbr.rel (%p2611_p4) target bundleno = 200 (0xc8), region = 84 }
  0xb0   : > { %s628_s13 = scalar_lea.vmem %s4166_s21, %s3742_s28 }
  0xb1   : > { %s3427_s14 = smov [#allocation10]   ;;  %s4167_s15 = sld [smem:[#allocation26_spill]] }
  0xb2   : > { %s646_s26 = sshll.u32 %s3427_s14, 4  ;;  %s647_s26 = int_to_ptr.vmem [resolvable:$true] %s646_s26 }
  0xb7   : > { %s3303_s29 = scalar_lea.hbm %s4167_s15, 256 }
  0xb8   : > { %p3304_p6 = scmp.ne.s32.totalorder %s4167_s15, %s3303_s29  ;;  %p3307_p8 = scmp.lt.u32.totalorder %s3303_s29, %s4167_s15 }
  0xba   : > { %p3309_p0 = pnand %p3307_p8, %p3304_p6 }
  0xbc   : > { %3312 = shalt.err (!%p3309_p0)  }
  0xbd   : > { %s3313_s25 = scalar_lea.vmem %s647_s26, 256  ;;  %p3318_p13 = scmp.lt.s32.totalorder %s647_s26, %s647_s26 }
  0xbe   : > { %p3314_p5 = scmp.ne.s32.totalorder %s647_s26, %s3313_s25  ;;  %p3319_p1 = scmp.lt.s32.totalorder %s3313_s25, %s3313_s25 }
  0xc0   : > { %p3320_p11 = por %p3319_p1, %p3318_p13 }
  0xc2   : > { %p3321_p2 = pnand %p3320_p11, %p3314_p5 }
  0xc4   : > { %3324 = shalt.err (!%p3321_p2)  }
  0xc5   : > { %649 = dma.hbm_to_vmem [thread:$0]  %s4167_s15, 256, %s647_s26, [#allocation11] }
  0xc6   : > { %3387 = dma.done.wait [#allocation11], 256 }
  0xc7   : > { %3388 = vsyncadd [#allocation11], 4294967040 }
  0xc8 PF: > { %v3063_v0 = vld [vmem:[%s3719_s20 + $0x4] ss:$12 sps:$4 sm:$0xff]   ;;  %v3065_v1 = vld [vmem:[%s3719_s20] ss:$12 sps:$4 sm:$0xff]   ;;  %v3428_v2 = vmov 0   ;;  %v3429_v3 = vmov 0.0   ;;  %s4168_s26 = scalar_lea.vmem %s4122_s3, %s3742_s28  ;;  %s4169_s19 = scalar_lea.vmem %s4127_s8, %s3742_s28 }
  0xc9   : > { %849 = vmatprep.mubr.bf16.mxu0 %v3428_v2  ;;  %2777 = vmatprep.subr.bf16.mxu1 %v3429_v3  ;;  %v3066_v4 = vld [vmem:[%s3719_s20 + $0x1c] ss:$12 sps:$4 sm:$0xff]   ;;  %v3068_v5 = vld [vmem:[%s3719_s20 + $0x18] ss:$12 sps:$4 sm:$0xff]   ;;  %v3069_v6 = vld [vmem:[%s3719_s20 + $0x34] ss:$12 sps:$4 sm:$0xff]  }
  0xca   : > { %817 = vmatprep.subr.bf16.mxu0 %v3063_v0  ;;  %v3071_v7 = vld [vmem:[%s3719_s20 + $0x30] ss:$12 sps:$4 sm:$0xff]   ;;  %v3072_v8 = vld [vmem:[%s3719_s20 + $0x4c] ss:$12 sps:$4 sm:$0xff]   ;;  %v3074_v9 = vld [vmem:[%s3719_s20 + $0x48] ss:$12 sps:$4 sm:$0xff]  }
  0xcb   : > { %818 = vmatpush1.bf16.msra.mxu0 %v3065_v1  ;;  %v3075_v10 = vld [vmem:[%s3719_s20 + $0x64] ss:$12 sps:$4 sm:$0xff]   ;;  %v3087_v11 = vld [vmem:[%s3719_s20 + $0x8] ss:$12 sps:$4 sm:$0xff]   ;;  %v3088_v12 = vld [vmem:[%s3719_s20 + $0x20] ss:$12 sps:$4 sm:$0xff]  }
  0xcc   : > { %819 = vmatprep.subr.bf16.mxu0 %v3066_v4  ;;  %2778 = vmatpush3.bf16.msra.mxu1 %v3087_v11  ;;  %v3077_v13 = vld [vmem:[%s3719_s20 + $0x60] ss:$12 sps:$4 sm:$0xff]   ;;  %v3078_v14 = vld [vmem:[%s3719_s20 + $0x7c] ss:$12 sps:$4 sm:$0xff]   ;;  %v3080_v15 = vld [vmem:[%s3719_s20 + $0x78] ss:$12 sps:$4 sm:$0xff]  }
  0xcd   : > { %2779 = vmatprep.subr.bf16.mxu1 %v3429_v3  ;;  %v3089_v16 = vld [vmem:[%s3719_s20 + $0x38] ss:$12 sps:$4 sm:$0xff]   ;;  %v3081_v17 = vld [vmem:[%s3719_s20 + $0x94] ss:$12 sps:$4 sm:$0xff]   ;;  %v3090_v18 = vld [vmem:[%s3719_s20 + $0x50] ss:$12 sps:$4 sm:$0xff]  }
  0xce   : > { %v3083_v19 = vld [vmem:[%s3719_s20 + $0x90] ss:$12 sps:$4 sm:$0xff]   ;;  %v3084_v20 = vld [vmem:[%s3719_s20 + $0xac] ss:$12 sps:$4 sm:$0xff]   ;;  %v3091_v21 = vld [vmem:[%s3719_s20 + $0x68] ss:$12 sps:$4 sm:$0xff]  }
  0xcf   : > { %820 = vmatpush1.bf16.msra.mxu0 %v3068_v5  ;;  %v3086_v22 = vld [vmem:[%s3719_s20 + $0xa8] ss:$12 sps:$4 sm:$0xff]   ;;  %v3813_v23 = vld [vmem:[#allocation10] sm:$0xff]  ;;  %v3094_v28 = vld [vmem:[%s3719_s20 + $0xb0] ss:$12 sps:$4 sm:$0xff]   ;;  %vm3430_vm0 = vmmov 0  }
  0xd0   : > { %821 = vmatprep.subr.bf16.mxu0 %v3069_v6  ;;  %2780 = vmatpush3.bf16.msra.mxu1 %v3088_v12  ;;  %v3815_v24 = vld [vmem:[#allocation10 + $0x8] sm:$0xff]  ;;  %v3093_v27 = vld [vmem:[%s3719_s20 + $0x98] ss:$12 sps:$4 sm:$0xff]   ;;  %vm985_vm1 = vcmask 261120   ;;  %s3432_s29 = smov 64   ;;  %s3433_s21 = smov 32  }
  0xd1   : > { %2781 = vmatprep.subr.bf16.mxu1 %v3429_v3  ;;  %v3092_v25 = vld [vmem:[%s3719_s20 + $0x80] ss:$12 sps:$4 sm:$0xff]   ;;  %v656_v26 = vpack.c.bf16 %v3815_v24, %v3813_v23  ;;  %2793 = vmatprep.mubr.msk.bf16.mxu1 %vm3430_vm0, %v3429_v3  ;;  %s3431_s20 = smov 96   ;;  %vm1454_vm2 = vcmask 1043456   ;;  %vm1354_vm3 = vcmask 64512   ;;  %vm1846_vm4 = vcmask 523264  }
  0xd2   : > { %vm1849_vm5 = vcmask 785408   ;;  %p2942_p10 = scmp.eq.s32.totalorder %s3531_s27, 1 }
  0xd3   : > { %822 = vmatpush1.bf16.msra.mxu0 %v3071_v7 }
  0xd4   : > { %823 = vmatprep.subr.bf16.mxu0 %v3072_v8  ;;  %2782 = vmatpush3.bf16.msra.mxu1 %v3089_v16 }
  0xd5   : > { %2783 = vmatprep.subr.bf16.mxu1 %v3429_v3 }
  0xd7   : > { %824 = vmatpush1.bf16.msra.mxu0 %v3074_v9 }
  0xd8   : > { %825 = vmatprep.subr.bf16.mxu0 %v3075_v10  ;;  %2784 = vmatpush3.bf16.msra.mxu1 %v3090_v18 }
  0xd9   : > { %2785 = vmatprep.subr.bf16.mxu1 %v3429_v3 }
  0xdb   : > { %826 = vmatpush1.bf16.msra.mxu0 %v3077_v13 }
  0xdc   : > { %827 = vmatprep.subr.bf16.mxu0 %v3078_v14  ;;  %2786 = vmatpush3.bf16.msra.mxu1 %v3091_v21 }
  0xdd   : > { %2787 = vmatprep.subr.bf16.mxu1 %v3429_v3 }
  0xdf   : > { %828 = vmatpush1.bf16.msra.mxu0 %v3080_v15 }
  0xe0   : > { %829 = vmatprep.subr.bf16.mxu0 %v3081_v17  ;;  %2788 = vmatpush3.bf16.msra.mxu1 %v3092_v25 }
  0xe1   : > { %2789 = vmatprep.subr.bf16.mxu1 %v3429_v3 }
  0xe3   : > { %830 = vmatpush1.bf16.msra.mxu0 %v3083_v19 }
  0xe4   : > { %831 = vmatprep.subr.bf16.mxu0 %v3084_v20  ;;  %2790 = vmatpush3.bf16.msra.mxu1 %v3093_v27 }
  0xe5   : > { %2791 = vmatprep.subr.bf16.mxu1 %v3429_v3 }
  0xe7   : > { %832 = vmatpush1.bf16.msra.mxu0 %v3086_v22 }
  0xe8   : > { %2821 = vmatprep.subr.bf16.mxu0 %v3429_v3  ;;  %2792 = vmatpush3.bf16.msra.mxu1 %v3094_v28 }
  0xe9   : > { %2797 = vmatprep.subr.bf16.mxu1 %v3429_v3 }
  0xea   : > { %850 = vmatmul.mubr.bf16.vlgmr.msra.gmra.mrb[0].mxu0 %v656_v26 }
  0xeb   : > { %2823 = vmatprep.mubr.msk.bf16.mxu0 %vm3430_vm0, %v3429_v3  ;;  %2794 = vmatmul.mubr.bf16.vlgmr.msra.gmra.mrb[0].mxu1 %v656_v26 }
  0xec   : > { %2799 = vmatprep.mubr.msk.bf16.mxu1 %vm3430_vm0, %v3429_v3 }
 0x1bd   : > { %v851_v29 = vpop.f32.mrb[0].mxu0 }
 0x1be   : > { %v853_v30 = vpop.f32.mrb[1].mxu0  ;;  %v921_v39 = vpack.c.bf16 %v851_v29, %v851_v29  ;;  %v3851_v42 = vpop.f32.mrb[0].mxu1 }
 0x1bf   : > { %931 = vrot.lane.b32.xlu0 %v853_v30, %s3431_s20  ;;  %v855_v31 = vpop.f32.mrb[2].mxu0  ;;  %v949_v32 = vpack.c.bf16 %v853_v30, %v853_v30  ;;  %v2795_v43 = vpop.f32.mrb[1].mxu1  ;;  %v977_v12 = vpack.c.bf16 %v3851_v42, %v3851_v42 }
 0x1c0   : > { %905 = vrot.lane.b32.xlu1 %v855_v31, %s3431_s20  ;;  %v857_v33 = vpop.f32.mrb[3].mxu0  ;;  %v3018_v34 = vpack.i.bf16 %v855_v31, %v851_v29  ;;  %v922_v41 = vpack.c.bf16 %v855_v31, %v855_v31  ;;  %v3853_v44 = vpop.f32.mrb[2].mxu1 }
 0x1c1   : > { %v990_v35 = vsel %vm985_vm1, %v949_v32, 0  ;;  %v3008_v36 = vpack.i.bf16 %v857_v33, %v851_v29  ;;  %v3013_v37 = vpack.i.bf16 %v857_v33, %v853_v30  ;;  %v950_v38 = vpack.c.bf16 %v857_v33, %v857_v33  ;;  %v2796_v45 = vpop.f32.mrb[3].mxu1 }
 0x1c2   : > { %2798 = vmatpush3.bf16.xpose.msra.mxu1 %v990_v35  ;;  %v1456_v16 = vsel %vm1454_vm2, %v977_v12, 0  ;;  %v978_v20 = vpack.c.bf16 %v3853_v44, %v3853_v44  ;;  %v3895_v25 = vpack.i.bf16 %v3853_v44, %v3851_v42 }
 0x1c3   : > { %3009 = vrot.lane.b32.xlu0 %v3008_v36, %s3431_s20  ;;  %2803 = vmatprep.subr.bf16.mxu1 %v3429_v3  ;;  %v1036_v40 = vsel %vm985_vm1, %v950_v38, 0 }
 0x1c4   : > { %3014 = vrot.lane.b32.xlu1 %v3013_v37, %s3432_s29  ;;  %v1502_v22 = vsel %vm1454_vm2, %v978_v20, 0 }
 0x1c7   : > { %3019 = vrot.lane.b32.xlu0 %v3018_v34, %s3432_s29 }
 0x1c8   : > { %3024 = vrot.lane.b32.xlu1 %v3013_v37, %s3433_s21 }
 0x1c9   : > { %2800 = vmatmul.mubr.msk.bf16.vlgmr.msra.gmra.mrb[4].mxu1 %vm985_vm1, %v921_v39 }
 0x1ca   : > { %2804 = vmatpush3.bf16.xpose.msra.mxu1 %v1036_v40  ;;  %2805 = vmatprep.mubr.msk.bf16.mxu1 %vm3430_vm0, %v3429_v3 }
 0x1cb   : > { %3029 = vrot.lane.b32.xlu0 %v3018_v34, %s3433_s21  ;;  %2809 = vmatprep.subr.bf16.mxu1 %v3429_v3 }
 0x1d1   : > { %2806 = vmatmul.mubr.msk.bf16.vlgmr.msra.gmra.mrb[8].mxu1 %vm985_vm1, %v922_v41 }
 0x1d2   : > { %2811 = vmatprep.mubr.msk.bf16.mxu1 %vm3430_vm0, %v3429_v3 }
 0x231   : > { %v932_v46 = vpop.permute.xlu0 %931 }
 0x232   : > { %v951_v47 = vpack.c.bf16 %v932_v46, %v932_v46  ;;  %v906_v48 = vpop.permute.xlu1 %905 }
 0x233   : > { %v924_v6 = vpack.c.bf16 %v906_v48, %v906_v48 }
 0x234   : > { %v1082_v49 = vsel %vm985_vm1, %v951_v47, 0 }
 0x235   : > { %v3010_v50 = vpop.permute.xlu0 %3009  ;;  %2810 = vmatpush3.bf16.xpose.msra.mxu1 %v1082_v49 }
 0x236   : > { %v3012_v51 = vunpack.i.h.bf16 %v3010_v50  ;;  %v3011_v52 = vunpack.i.l.bf16 %v3010_v50  ;;  %v3015_v53 = vpop.permute.xlu1 %3014  ;;  %2815 = vmatprep.subr.bf16.mxu1 %v3429_v3 }
 0x237   : > { %v3016_v54 = vunpack.i.l.bf16 %v3015_v53  ;;  %v3017_v62 = vunpack.i.h.bf16 %v3015_v53 }
 0x238   : > { %v952_v55 = vpack.c.bf16 %v3012_v51, %v3012_v51  ;;  %v923_v57 = vpack.c.bf16 %v3011_v52, %v3011_v52 }
 0x239   : > { %v953_v56 = vpack.c.bf16 %v3016_v54, %v3016_v54  ;;  %v3020_v58 = vpop.permute.xlu0 %3019  ;;  %v954_v4 = vpack.c.bf16 %v3017_v62, %v3017_v62 }
 0x23a   : > { %v3025_v59 = vpop.permute.xlu1 %3024  ;;  %v1128_v63 = vsel %vm985_vm1, %v952_v55, 0  ;;  %v3021_v0 = vunpack.i.l.bf16 %v3020_v58  ;;  %v3022_v13 = vunpack.i.h.bf16 %v3020_v58 }
 0x23b   : > { %v3026_v60 = vunpack.i.l.bf16 %v3025_v59  ;;  %v1174_v61 = vsel %vm985_vm1, %v953_v56, 0  ;;  %v3027_v9 = vunpack.i.h.bf16 %v3025_v59  ;;  %v1220_v10 = vsel %vm985_vm1, %v954_v4, 0 }
 0x23c   : > { %2812 = vmatmul.mubr.msk.bf16.vlgmr.msra.gmra.mrb[12].mxu1 %vm985_vm1, %v923_v57  ;;  %2822 = vmatpush3.bf16.xpose.msra.mxu0 %v1174_v61  ;;  %v925_v5 = vpack.c.bf16 %v3021_v0, %v3021_v0  ;;  %v926_v17 = vpack.c.bf16 %v3022_v13, %v3022_v13 }
 0x23d   : > { %2816 = vmatpush3.bf16.xpose.msra.mxu1 %v1128_v63  ;;  %2817 = vmatprep.mubr.msk.bf16.mxu1 %vm3430_vm0, %v3429_v3  ;;  %v955_v1 = vpack.c.bf16 %v3026_v60, %v3026_v60  ;;  %v3030_v7 = vpop.permute.xlu0 %3029  ;;  %v956_v14 = vpack.c.bf16 %v3027_v9, %v3027_v9 }
 0x23e   : > { %2833 = vmatprep.subr.bf16.mxu0 %v3429_v3  ;;  %2827 = vmatprep.subr.bf16.mxu1 %v3429_v3  ;;  %v3031_v11 = vunpack.i.l.bf16 %v3030_v7  ;;  %v3032_v19 = vunpack.i.h.bf16 %v3030_v7 }
 0x23f   : > { %v1266_v8 = vsel %vm985_vm1, %v955_v1, 0  ;;  %v1312_v18 = vsel %vm985_vm1, %v956_v14, 0 }
 0x240   : > { %v927_v15 = vpack.c.bf16 %v3031_v11, %v3031_v11  ;;  %v928_v21 = vpack.c.bf16 %v3032_v19, %v3032_v19 }
 0x243   : > { %2824 = vmatmul.mubr.msk.bf16.vlgmr.msra.gmra.mrb[4].mxu0 %vm985_vm1, %v925_v5 }
 0x244   : > { %2818 = vmatmul.mubr.msk.bf16.vlgmr.msra.gmra.mrb[16].mxu1 %vm985_vm1, %v924_v6  ;;  %2834 = vmatpush3.bf16.xpose.msra.mxu0 %v1266_v8 }
 0x245   : > { %2828 = vmatpush3.bf16.xpose.msra.mxu1 %v1220_v10  ;;  %2835 = vmatprep.mubr.msk.bf16.mxu0 %vm3430_vm0, %v3429_v3 }
 0x246   : > { %2829 = vmatprep.mubr.msk.bf16.mxu1 %vm3430_vm0, %v3429_v3  ;;  %2839 = vmatprep.subr.bf16.mxu1 %v3429_v3 }
 0x247   : > { %2845 = vmatprep.subr.bf16.mxu0 %v3429_v3 }
 0x24b   : > { %2836 = vmatmul.mubr.msk.bf16.vlgmr.msra.gmra.mrb[8].mxu0 %vm985_vm1, %v927_v15 }
 0x24c   : > { %2830 = vmatmul.mubr.msk.bf16.vlgmr.msra.gmra.mrb[20].mxu1 %vm985_vm1, %v926_v17  ;;  %2846 = vmatpush3.bf16.msra.mxu0 %v1456_v16 }
 0x24d   : > { %2840 = vmatpush3.bf16.xpose.msra.mxu1 %v1312_v18  ;;  %2841 = vmatprep.mubr.msk.bf16.mxu1 %vm3430_vm0, %v3429_v3 }
 0x24e   : > { %2851 = vmatprep.subr.bf16.mxu1 %v3429_v3  ;;  %2847 = vmatprep.mubr.msk.bf16.mxu0 %vm3430_vm0, %v3429_v3 }
 0x24f   : > { %2857 = vmatprep.subr.bf16.mxu0 %v3429_v3 }
 0x254   : > { %2842 = vmatmul.mubr.msk.bf16.vlgmr.msra.gmra.mrb[24].mxu1 %vm985_vm1, %v928_v21 }
 0x255   : > { %2852 = vmatpush3.bf16.msra.mxu1 %v1502_v22  ;;  %2853 = vmatprep.mubr.msk.bf16.mxu1 %vm3430_vm0, %v3429_v3 }
 0x256   : > { %2863 = vmatprep.subr.bf16.mxu1 %v3429_v3 }
 0x29c   : > { %v1026_v26 = vpop.f32.mrb[4].mxu1 }
 0x29d   : > { %v2801_v27 = vpop.f32.mrb[5].mxu1  ;;  %v1355_v28 = vsel %vm1354_vm3, %v1026_v26, -inf }
 0x29e   : > { %v1029_v29 = vpop.f32.mrb[6].mxu1  ;;  %1356 = vmax.xlane.f32.xlu1 %v1355_v28 }
 0x29f   : > { %v2802_v30 = vpop.f32.mrb[7].mxu1 }
 0x2a4   : > { %v1072_v31 = vpop.f32.mrb[8].mxu1 }
 0x2a5   : > { %v2807_v32 = vpop.f32.mrb[9].mxu1  ;;  %v1358_v33 = vsel %vm1354_vm3, %v1072_v31, -inf }
 0x2a6   : > { %1359 = vmax.xlane.f32.xlu0 %v1358_v33  ;;  %v1075_v34 = vpop.f32.mrb[10].mxu1 }
 0x2a7   : > { %v2808_v35 = vpop.f32.mrb[11].mxu1 }
 0x30f   : > { %v1118_v36 = vpop.f32.mrb[12].mxu1 }
 0x310   : > { %v2813_v37 = vpop.f32.mrb[13].mxu1  ;;  %v1361_v38 = vsel %vm1354_vm3, %v1118_v36, -inf }
 0x311   : > { %1362 = vmax.xlane.f32.xlu0 %v1361_v38  ;;  %v1121_v39 = vpop.f32.mrb[14].mxu1 }
 0x312   : > { %v2814_v40 = vpop.f32.mrb[15].mxu1 }
 0x316   : > { %v1210_v41 = vpop.f32.mrb[4].mxu0 }
 0x317   : > { %v1164_v42 = vpop.f32.mrb[16].mxu1  ;;  %v2825_v43 = vpop.f32.mrb[5].mxu0  ;;  %v1367_v44 = vsel %vm1354_vm3, %v1210_v41, -inf }
 0x318   : > { %v1213_v45 = vpop.f32.mrb[6].mxu0  ;;  %1368 = vmax.xlane.f32.xlu0 %v1367_v44  ;;  %v2819_v46 = vpop.f32.mrb[17].mxu1  ;;  %v1364_v47 = vsel %vm1354_vm3, %v1164_v42, -inf }
 0x319   : > { %v2826_v48 = vpop.f32.mrb[7].mxu0  ;;  %1365 = vmax.xlane.f32.xlu1 %v1364_v47  ;;  %v1167_v49 = vpop.f32.mrb[18].mxu1 }
 0x31a   : > { %v2820_v50 = vpop.f32.mrb[19].mxu1 }
 0x31e   : > { %v1302_v51 = vpop.f32.mrb[8].mxu0 }
 0x31f   : > { %v3902_v52 = vpop.f32.mrb[20].mxu1  ;;  %v2837_v53 = vpop.f32.mrb[9].mxu0  ;;  %v1373_v54 = vsel %vm1354_vm3, %v1302_v51, -inf }
 0x320   : > { %v1305_v55 = vpop.f32.mrb[10].mxu0  ;;  %1374 = vmax.xlane.f32.xlu0 %v1373_v54  ;;  %v2831_v56 = vpop.f32.mrb[21].mxu1  ;;  %v1370_v57 = vsel %vm1354_vm3, %v3902_v52, -inf }
 0x321   : > { %v2838_v58 = vpop.f32.mrb[11].mxu0  ;;  %1371 = vmax.xlane.f32.xlu1 %v1370_v57  ;;  %v1259_v59 = vpop.f32.mrb[22].mxu1 }
 0x322   : > { %v2832_v60 = vpop.f32.mrb[23].mxu1 }
 0x327   : > { %v3907_v61 = vpop.f32.mrb[24].mxu1 }
 0x328   : > { %v2843_v62 = vpop.f32.mrb[25].mxu1  ;;  %v1376_v63 = vsel %vm1354_vm3, %v3907_v61, -inf }
 0x329   : > { %1377 = vmax.xlane.f32.xlu1 %v1376_v63  ;;  %v1351_v0 = vpop.f32.mrb[26].mxu1 }
 0x32a   : > { %v2844_v1 = vpop.f32.mrb[27].mxu1 }
 0x32b   : > { %v1357_v4 = vpop.xlane.xlu1 %1356 }
 0x32c   : > { %v1379_v5 = vsub.f32 %v1026_v26, %v1357_v4 }
 0x32e   : > { %v1387_v6 = vmul.f32 1.442695, %v1379_v5 }
 0x330   : > { %3143 = vpow2.f32 %v1387_v6 }
 0x333   : > { %v1360_v7 = vpop.xlane.xlu0 %1359 }
 0x334   : > { %v1380_v8 = vsub.f32 %v1072_v31, %v1360_v7 }
 0x336   : > { %v1389_v9 = vmul.f32 1.442695, %v1380_v8 }
 0x338   : > { %3145 = vpow2.f32 %v1389_v9 }
 0x33a   : > { %v3144_v10 = vpop.eup %3143 }
 0x33b   : > { %v1403_v11 = vsel %vm1354_vm3, %v3144_v10, 0.0 }
 0x33c   : > { %1404 = vadd.xlane.f32.xlu0 %v1403_v11 }
 0x342   : > { %v3146_v12 = vpop.eup %3145 }
 0x343   : > { %v1406_v13 = vsel %vm1354_vm3, %v3146_v12, 0.0 }
 0x344   : > { %1407 = vadd.xlane.f32.xlu1 %v1406_v13 }
 0x39e   : > { %v1363_v14 = vpop.xlane.xlu0 %1362 }
 0x39f   : > { %v1381_v15 = vsub.f32 %v1118_v36, %v1363_v14 }
 0x3a1   : > { %v1391_v16 = vmul.f32 1.442695, %v1381_v15 }
 0x3a3   : > { %3147 = vpow2.f32 %v1391_v16 }
 0x3a5   : > { %v1369_v17 = vpop.xlane.xlu0 %1368 }
 0x3a6   : > { %v1383_v18 = vsub.f32 %v1210_v41, %v1369_v17  ;;  %v1366_v19 = vpop.xlane.xlu1 %1365 }
 0x3a7   : > { %v1382_v20 = vsub.f32 %v1164_v42, %v1366_v19 }
 0x3a8   : > { %v1395_v21 = vmul.f32 1.442695, %v1383_v18 }
 0x3a9   : > { %v1393_v22 = vmul.f32 1.442695, %v1382_v20 }
 0x3aa   : > { %3149 = vpow2.f32 %v1395_v21 }
 0x3ab   : > { %3151 = vpow2.f32 %v1393_v22 }
 0x3ad   : > { %v3148_v26 = vpop.eup %3147  ;;  %v1375_v27 = vpop.xlane.xlu0 %1374 }
 0x3ae   : > { %v1385_v28 = vsub.f32 %v1302_v51, %v1375_v27  ;;  %v1409_v29 = vsel %vm1354_vm3, %v3148_v26, 0.0  ;;  %v1372_v37 = vpop.xlane.xlu1 %1371 }
 0x3af   : > { %1410 = vadd.xlane.f32.xlu0 %v1409_v29  ;;  %v1384_v43 = vsub.f32 %v3902_v52, %v1372_v37 }
 0x3b0   : > { %v1399_v30 = vmul.f32 1.442695, %v1385_v28 }
 0x3b1   : > { %v1397_v45 = vmul.f32 1.442695, %v1384_v43 }
 0x3b2   : > { %3153 = vpow2.f32 %v1399_v30 }
 0x3b4   : > { %v3914_v31 = vpop.eup %3149 }
 0x3b5   : > { %v3152_v32 = vpop.eup %3151  ;;  %v1415_v33 = vsel %vm1354_vm3, %v3914_v31, 0.0 }
 0x3b6   : > { %1416 = vadd.xlane.f32.xlu0 %v1415_v33  ;;  %v1412_v34 = vsel %vm1354_vm3, %v3152_v32, 0.0  ;;  %v1378_v39 = vpop.xlane.xlu1 %1377 }
 0x3b7   : > { %1413 = vadd.xlane.f32.xlu1 %v1412_v34  ;;  %v1386_v46 = vsub.f32 %v3907_v61, %v1378_v39 }
 0x3b9   : > { %v1401_v49 = vmul.f32 1.442695, %v1386_v46 }
 0x3bc   : > { %v3919_v35 = vpop.eup %3153 }
 0x3bd   : > { %v1421_v36 = vsel %vm1354_vm3, %v3919_v35, 0.0 }
 0x3be   : > { %1422 = vadd.xlane.f32.xlu0 %v1421_v36 }
 0x3c8   : > { %3039 = vrot.lane.b32.xlu1 %v3895_v25, %s3432_s29 }
 0x3c9   : > { %v1405_v38 = vpop.xlane.xlu0 %1404 }
 0x3ca   : > { %3155 = vrcp.f32 %v1405_v38 }
 0x3d1   : > { %v1408_v40 = vpop.xlane.xlu1 %1407 }
 0x3d2   : > { %3157 = vrcp.f32 %v1408_v40 }
 0x3d3   : > { %3159 = vpow2.f32 %v1397_v45 }
 0x3d4   : > { %v3156_v41 = vpop.eup %3155  ;;  %3034 = vrot.lane.b32.xlu0 %v3895_v25, %s3431_s20  ;;  %3161 = vpow2.f32 %v1401_v49  ;;  %v3096_v49 = vld [vmem:[%s3726_s0 + $0x8] sm:$0xff]  }
 0x3d5   : > { %v1435_v42 = vmul.f32 %v3156_v41, %v3144_v10 }
 0x3d7   : > { %v1443_v44 = vpack.c.bf16 %v1435_v42, %v1435_v42 }
 0x3d9   : > { %2848 = vmatmul.mubr.msk.bf16.vlgmr.msra.gmra.mrb[12].mxu0 %vm1354_vm3, %v1443_v44 }
 0x3da   : > { %2859 = vmatprep.mubr.msk.bf16.mxu0 %vm3430_vm0, %v3429_v3 }
 0x3dc   : > { %v3158_v47 = vpop.eup %3157 }
 0x3dd   : > { %v1436_v48 = vmul.f32 %v3158_v47, %v3146_v12  ;;  %v3935_v51 = vpop.eup %3159 }
 0x3de   : > { %v1418_v52 = vsel %vm1354_vm3, %v3935_v51, 0.0  ;;  %v3939_v53 = vpop.eup %3161 }
 0x3df   : > { %v1444_v50 = vpack.c.bf16 %v1436_v48, %v1436_v48  ;;  %v1424_v54 = vsel %vm1354_vm3, %v3939_v53, 0.0  ;;  %v3095_v48 = vld [vmem:[%s3726_s0] sm:$0xff]  }
 0x3e1   : > { %2854 = vmatmul.mubr.msk.bf16.vlgmr.msra.gmra.mrb[28].mxu1 %vm1354_vm3, %v1444_v50  ;;  %v3097_v50 = vld [vmem:[%s3726_s0 + $0x10] sm:$0xff]  }
 0x3e2   : > { %2865 = vmatprep.mubr.msk.bf16.mxu1 %vm3430_vm0, %v3429_v3 }
 0x3ec   : > { %1419 = vadd.xlane.f32.xlu1 %v1418_v52 }
 0x3f0   : > { %1425 = vadd.xlane.f32.xlu1 %v1424_v54 }
 0x401   : > { %3044 = vrot.lane.b32.xlu1 %v3895_v25, %s3433_s21 }
 0x43c   : > { %v1411_v55 = vpop.xlane.xlu0 %1410 }
 0x43d   : > { %3163 = vrcp.f32 %v1411_v55 }
 0x443   : > { %v1417_v57 = vpop.xlane.xlu0 %1416 }
 0x444   : > { %v1414_v56 = vpop.xlane.xlu1 %1413 }
 0x445   : > { %3165 = vrcp.f32 %v1414_v56 }
 0x446   : > { %3167 = vrcp.f32 %v1417_v57  ;;  %v3098_v57 = vld [vmem:[%s3726_s0 + $0x18] sm:$0xff]  }
 0x447   : > { %v3164_v60 = vpop.eup %3163 }
 0x448   : > { %v3040_v59 = vpop.permute.xlu1 %3039  ;;  %v1437_v5 = vmul.f32 %v3164_v60, %v3148_v26  ;;  %v3099_v60 = vld [vmem:[%s3726_s0 + $0x20] sm:$0xff]  }
 0x449   : > { %v3042_v63 = vunpack.i.h.bf16 %v3040_v59  ;;  %v3041_v0 = vunpack.i.l.bf16 %v3040_v59 }
 0x44a   : > { %v1445_v12 = vpack.c.bf16 %v1437_v5, %v1437_v5  ;;  %v3102_v5 = vld [vmem:[%s3726_s0 + $0x38] sm:$0xff]  }
 0x44b   : > { %v1423_v58 = vpop.xlane.xlu0 %1422  ;;  %v982_v25 = vpack.c.bf16 %v3042_v63, %v3042_v63  ;;  %v981_v9 = vpack.c.bf16 %v3041_v0, %v3041_v0 }
 0x44c   : > { %3169 = vrcp.f32 %v1423_v58 }
 0x44d   : > { %v1640_v15 = vsel %vm1454_vm2, %v981_v9, 0  ;;  %v1686_v16 = vsel %vm1454_vm2, %v982_v25, 0 }
 0x44f   : > { %v3166_v61 = vpop.eup %3165  ;;  %v3035_v62 = vpop.permute.xlu0 %3034 }
 0x450   : > { %v3037_v1 = vunpack.i.h.bf16 %v3035_v62  ;;  %v3036_v4 = vunpack.i.l.bf16 %v3035_v62  ;;  %v1438_v6 = vmul.f32 %v3166_v61, %v3152_v32  ;;  %v3168_v14 = vpop.eup %3167 }
 0x451   : > { %v1439_v17 = vmul.f32 %v3168_v14, %v3914_v31 }
 0x452   : > { %v980_v7 = vpack.c.bf16 %v3037_v1, %v3037_v1  ;;  %v979_v8 = vpack.c.bf16 %v3036_v4, %v3036_v4  ;;  %v1446_v13 = vpack.c.bf16 %v1438_v6, %v1438_v6  ;;  %v3100_v1 = vld [vmem:[%s3726_s0 + $0x28] sm:$0xff]   ;;  %v3101_v4 = vld [vmem:[%s3726_s0 + $0x30] sm:$0xff]  }
 0x453   : > { %v1447_v18 = vpack.c.bf16 %v1439_v17, %v1439_v17 }
 0x454   : > { %v1548_v10 = vsel %vm1454_vm2, %v979_v8, 0  ;;  %v1594_v11 = vsel %vm1454_vm2, %v980_v7, 0 }
 0x455   : > { %2858 = vmatpush3.bf16.msra.mxu0 %v1548_v10  ;;  %2864 = vmatpush3.bf16.msra.mxu1 %v1594_v11 }
 0x456   : > { %2869 = vmatprep.subr.bf16.mxu0 %v3429_v3  ;;  %2875 = vmatprep.subr.bf16.mxu1 %v3429_v3  ;;  %v3170_v21 = vpop.eup %3169 }
 0x457   : > { %v1441_v29 = vmul.f32 %v3170_v21, %v3919_v35 }
 0x458   : > { %2860 = vmatmul.mubr.msk.bf16.vlgmr.msra.gmra.mrb[16].mxu0 %vm1354_vm3, %v1445_v12  ;;  %2866 = vmatmul.mubr.msk.bf16.vlgmr.msra.gmra.mrb[32].mxu1 %vm1354_vm3, %v1446_v13 }
 0x459   : > { %2870 = vmatpush3.bf16.msra.mxu0 %v1640_v15  ;;  %2876 = vmatpush3.bf16.msra.mxu1 %v1686_v16  ;;  %v1449_v37 = vpack.c.bf16 %v1441_v29, %v1441_v29 }
 0x45a   : > { %2871 = vmatprep.mubr.msk.bf16.mxu0 %vm3430_vm0, %v3429_v3  ;;  %2881 = vmatprep.subr.bf16.mxu0 %v3429_v3 }
 0x45b   : > { %2877 = vmatprep.mubr.msk.bf16.mxu1 %vm3430_vm0, %v3429_v3  ;;  %2887 = vmatprep.subr.bf16.mxu1 %v3429_v3 }
 0x460   : > { %2872 = vmatmul.mubr.msk.bf16.vlgmr.msra.gmra.mrb[20].mxu0 %vm1354_vm3, %v1447_v18 }
 0x461   : > { %2883 = vmatprep.mubr.msk.bf16.mxu0 %vm3430_vm0, %v3429_v3 }
 0x479   : > { %v1420_v19 = vpop.xlane.xlu1 %1419 }
 0x47a   : > { %3171 = vrcp.f32 %v1420_v19 }
 0x47d   : > { %v1426_v20 = vpop.xlane.xlu1 %1425 }
 0x47e   : > { %3173 = vrcp.f32 %v1426_v20 }
 0x481   : > { %v3045_v22 = vpop.permute.xlu1 %3044 }
 0x482   : > { %v3047_v26 = vunpack.i.h.bf16 %v3045_v22  ;;  %v3046_v27 = vunpack.i.l.bf16 %v3045_v22 }
 0x484   : > { %v3172_v28 = vpop.eup %3171  ;;  %v983_v30 = vpack.c.bf16 %v3046_v27, %v3046_v27  ;;  %v984_v32 = vpack.c.bf16 %v3047_v26, %v3047_v26 }
 0x485   : > { %v1440_v31 = vmul.f32 %v3172_v28, %v3935_v51 }
 0x486   : > { %v1732_v33 = vsel %vm1454_vm2, %v983_v30, 0  ;;  %v1778_v38 = vsel %vm1454_vm2, %v984_v32, 0 }
 0x487   : > { %2882 = vmatpush3.bf16.msra.mxu0 %v1732_v33  ;;  %v1448_v34 = vpack.c.bf16 %v1440_v31, %v1440_v31 }
 0x488   : > { %v3174_v36 = vpop.eup %3173  ;;  %2893 = vmatprep.subr.bf16.mxu0 %v3429_v3 }
 0x489   : > { %2878 = vmatmul.mubr.msk.bf16.vlgmr.msra.gmra.mrb[36].mxu1 %vm1354_vm3, %v1448_v34  ;;  %v1442_v35 = vmul.f32 %v3174_v36, %v3939_v53 }
 0x48a   : > { %2888 = vmatpush3.bf16.msra.mxu1 %v1778_v38  ;;  %2884 = vmatmul.mubr.msk.bf16.vlgmr.msra.gmra.mrb[24].mxu0 %vm1354_vm3, %v1449_v37  ;;  %v2652_v38 = vld [vmem:[%s4168_s26] ss:$0 sm:$0xff] }
 0x48b   : > { %2889 = vmatprep.mubr.msk.bf16.mxu1 %vm3430_vm0, %v3429_v3  ;;  %2909 = vmatprep.mubr.msk.bf16.mxu0 %vm3430_vm0, %v3429_v3  ;;  %v1450_v39 = vpack.c.bf16 %v1442_v35, %v1442_v35 }
 0x48c   : > { %2894 = vmatpush3.bf16.msra.mxu0 %v3095_v48  ;;  %v3108_v48 = vld [vmem:[%s3732_s18 + $0x14] ss:$8 sps:$4 sm:$0xff]  }
 0x48d   : > { %2895 = vmatprep.subr.bf16.mxu0 %v3429_v3 }
 0x490   : > { %2896 = vmatpush3.bf16.msra.mxu0 %v3096_v49  ;;  %v3106_v49 = vld [vmem:[%s3732_s18 + $0x10] ss:$8 sps:$4 sm:$0xff]  }
 0x491   : > { %2890 = vmatmul.mubr.msk.bf16.vlgmr.msra.gmra.mrb[40].mxu1 %vm1354_vm3, %v1450_v39  ;;  %2897 = vmatprep.subr.bf16.mxu0 %v3429_v3 }
 0x492   : > { %2149 = vmatprep.mubr.bf16.mxu1 %v3428_v2 }
 0x494   : > { %2898 = vmatpush3.bf16.msra.mxu0 %v3097_v50 }
 0x495   : > { %2899 = vmatprep.subr.bf16.mxu0 %v3429_v3 }
 0x498   : > { %2900 = vmatpush3.bf16.msra.mxu0 %v3098_v57  ;;  %v3114_v57 = vld [vmem:[%s3732_s18 + $0x34] ss:$8 sps:$4 sm:$0xff]  }
 0x499   : > { %2901 = vmatprep.subr.bf16.mxu0 %v3429_v3 }
 0x49c   : > { %2902 = vmatpush3.bf16.msra.mxu0 %v3099_v60  ;;  %v3115_v60 = vld [vmem:[%s3732_s18 + $0x40] ss:$8 sps:$4 sm:$0xff]  }
 0x49d   : > { %2903 = vmatprep.subr.bf16.mxu0 %v3429_v3 }
 0x4a0   : > { %2904 = vmatpush3.bf16.msra.mxu0 %v3100_v1  ;;  %v3126_v1 = vld [vmem:[%s3732_s18 + $0x74] ss:$8 sps:$4 sm:$0xff]  }
 0x4a1   : > { %2905 = vmatprep.subr.bf16.mxu0 %v3429_v3 }
 0x4a4   : > { %2906 = vmatpush3.bf16.msra.mxu0 %v3101_v4  ;;  %v3124_v4 = vld [vmem:[%s3732_s18 + $0x70] ss:$8 sps:$4 sm:$0xff]  }
 0x4a5   : > { %2907 = vmatprep.subr.bf16.mxu0 %v3429_v3 }
 0x4a8   : > { %2908 = vmatpush3.bf16.msra.mxu0 %v3102_v5  ;;  %v3127_v5 = vld [vmem:[%s3734_s1 + $0x40] sm:$0xff]  }
 0x4a9   : > { %2755 = vmatprep.subr.bf16.mxu0 %v3127_v5 }
 0x4ac   : > { %v3977_v40 = vpop.f32.mrb[12].mxu0 }
 0x4ad   : > { %v2849_v41 = vpop.f32.mrb[13].mxu0 }
 0x4ae   : > { %v1495_v42 = vpop.f32.mrb[14].mxu0 }
 0x4af   : > { %v2850_v43 = vpop.f32.mrb[15].mxu0 }
 0x4b4   : > { %v3979_v44 = vpop.f32.mrb[28].mxu1 }
 0x4b5   : > { %v2855_v45 = vpop.f32.mrb[29].mxu1 }
 0x4b6   : > { %v1541_v46 = vpop.f32.mrb[30].mxu1 }
 0x4b7   : > { %v2856_v47 = vpop.f32.mrb[31].mxu1  ;;  %v3103_v46 = vld [vmem:[%s3732_s18] ss:$8 sps:$4 sm:$0xff]  }
 0x4b8   : > { %v3105_v47 = vld [vmem:[%s3732_s18 + $0x4] ss:$8 sps:$4 sm:$0xff]  }
 0x4b9   : > { %2117 = vmatprep.subr.bf16.mxu1 %v3105_v47 }
 0x4ba   : > { %2118 = vmatpush1.bf16.msra.mxu1 %v3103_v46 }
 0x4bb   : > { %2119 = vmatprep.subr.bf16.mxu1 %v3108_v48 }
 0x4be   : > { %2120 = vmatpush1.bf16.msra.mxu1 %v3106_v49 }
 0x52b   : > { %v1584_v2 = vpop.f32.mrb[16].mxu0  ;;  %v1630_v51 = vpop.f32.mrb[32].mxu1 }
 0x52c   : > { %v3048_v52 = vpack.i.bf16 %v1630_v51, %v1584_v2  ;;  %v2861_v53 = vpop.f32.mrb[17].mxu0  ;;  %v2867_v54 = vpop.f32.mrb[33].mxu1 }
 0x52d   : > { %v1587_v55 = vpop.f32.mrb[18].mxu0  ;;  %v1633_v56 = vpop.f32.mrb[34].mxu1 }
 0x52e   : > { %v2862_v58 = vpop.f32.mrb[19].mxu0  ;;  %3049 = vrot.lane.b32.xlu0 %v3048_v52, %s3433_s21  ;;  %v2868_v59 = vpop.f32.mrb[35].mxu1  ;;  %v3111_v55 = vld [vmem:[%s3732_s18 + $0x24] ss:$8 sps:$4 sm:$0xff]   ;;  %v3109_v56 = vld [vmem:[%s3732_s18 + $0x20] ss:$8 sps:$4 sm:$0xff]  }
 0x52f   : > { %2121 = vmatprep.subr.bf16.mxu1 %v3111_v55  ;;  %v3112_v58 = vld [vmem:[%s3732_s18 + $0x30] ss:$8 sps:$4 sm:$0xff]   ;;  %v3117_v59 = vld [vmem:[%s3732_s18 + $0x44] ss:$8 sps:$4 sm:$0xff]  }
 0x530   : > { %2122 = vmatpush1.bf16.msra.mxu1 %v3109_v56 }
 0x531   : > { %2123 = vmatprep.subr.bf16.mxu1 %v3114_v57 }
 0x533   : > { %v1676_v61 = vpop.f32.mrb[20].mxu0 }
 0x534   : > { %v2873_v62 = vpop.f32.mrb[21].mxu0  ;;  %2124 = vmatpush1.bf16.msra.mxu1 %v3112_v58 }
 0x535   : > { %v1679_v63 = vpop.f32.mrb[22].mxu0  ;;  %2125 = vmatprep.subr.bf16.mxu1 %v3117_v59  ;;  %v3118_v62 = vld [vmem:[%s3732_s18 + $0x50] ss:$8 sps:$4 sm:$0xff]  }
 0x536   : > { %v2874_v0 = vpop.f32.mrb[23].mxu0  ;;  %v3123_v63 = vld [vmem:[%s3732_s18 + $0x64] ss:$8 sps:$4 sm:$0xff]  }
 0x537   : > { %v3121_v0 = vld [vmem:[%s3732_s18 + $0x60] ss:$8 sps:$4 sm:$0xff]  }
 0x538   : > { %2126 = vmatpush1.bf16.msra.mxu1 %v3115_v60 }
 0x55c   : > { %v1722_v6 = vpop.f32.mrb[36].mxu1 }
 0x55d   : > { %v3053_v7 = vpack.i.bf16 %v1722_v6, %v1676_v61  ;;  %v2879_v8 = vpop.f32.mrb[37].mxu1  ;;  %v1768_v25 = vpop.f32.mrb[24].mxu0  ;;  %v3120_v61 = vld [vmem:[%s3732_s18 + $0x54] ss:$8 sps:$4 sm:$0xff]   ;;  %v3128_v6 = vld [vmem:[%s3734_s1] sm:$0xff]  }
 0x55e   : > { %v1725_v9 = vpop.f32.mrb[38].mxu1  ;;  %v2885_v10 = vpop.f32.mrb[25].mxu0  ;;  %2127 = vmatprep.subr.bf16.mxu1 %v3120_v61  ;;  %v3130_v8 = vld [vmem:[%s3734_s1 + $0x8] sm:$0xff]  }
 0x55f   : > { %v1771_v11 = vpop.f32.mrb[26].mxu0  ;;  %3054 = vrot.lane.b32.xlu1 %v3053_v7, %s3432_s29  ;;  %v2880_v12 = vpop.f32.mrb[39].mxu1  ;;  %2128 = vmatpush1.bf16.msra.mxu1 %v3118_v62  ;;  %v3129_v7 = vld [vmem:[%s3734_s1 + $0x48] sm:$0xff]   ;;  %v3132_v9 = vld [vmem:[%s3734_s1 + $0x10] sm:$0xff]   ;;  %v3133_v10 = vld [vmem:[%s3734_s1 + $0x58] sm:$0xff]  }
 0x560   : > { %v2886_v13 = vpop.f32.mrb[27].mxu0  ;;  %2129 = vmatprep.subr.bf16.mxu1 %v3123_v63  ;;  %v3134_v11 = vld [vmem:[%s3734_s1 + $0x18] sm:$0xff]   ;;  %v3135_v12 = vld [vmem:[%s3734_s1 + $0x60] sm:$0xff]  }
 0x561   : > { %v3136_v13 = vld [vmem:[%s3734_s1 + $0x20] sm:$0xff]  }
 0x563   : > { %2130 = vmatpush1.bf16.msra.mxu1 %v3121_v0 }
 0x564   : > { %v1814_v14 = vpop.f32.mrb[40].mxu1  ;;  %2131 = vmatprep.subr.bf16.mxu1 %v3126_v1 }
 0x565   : > { %v3058_v15 = vpack.i.bf16 %v1814_v14, %v1768_v25  ;;  %v2891_v16 = vpop.f32.mrb[41].mxu1  ;;  %v3131_v25 = vld [vmem:[%s3734_s1 + $0x50] sm:$0xff]   ;;  %v3137_v14 = vld [vmem:[%s3734_s1 + $0x68] sm:$0xff]  }
 0x566   : > { %v1817_v17 = vpop.f32.mrb[42].mxu1 }
 0x567   : > { %3059 = vrot.lane.b32.xlu0 %v3058_v15, %s3431_s20  ;;  %v2892_v3 = vpop.f32.mrb[43].mxu1  ;;  %2132 = vmatpush1.bf16.msra.mxu1 %v3124_v4  ;;  %s3434_s20 = smov [#allocation10]  }
 0x568   : > { %s2395_s29 = sshll.u32 %s3434_s20, 4  ;;  %s2396_s29 = int_to_ptr.vmem [resolvable:$true] %s2395_s29 }
 0x569   : > { %p3332_p9 = scmp.lt.s32.totalorder %s2396_s29, %s2396_s29 }
 0x5a0   : > { %v3050_v18 = vpop.permute.xlu0 %3049 }
 0x5a1   : > { %v3052_v20 = vunpack.i.h.bf16 %v3050_v18  ;;  %v3051_v21 = vunpack.i.l.bf16 %v3050_v18 }
 0x5a3   : > { %v1845_v28 = vsel %vm985_vm1, %v3979_v44, %v3052_v20  ;;  %v1844_v29 = vsel %vm985_vm1, %v3977_v40, %v3051_v21  ;;  %v2661_v21 = vld [vmem:[%s4169_s19] ss:$0 sm:$0xff] }
 0x5d1   : > { %v3055_v19 = vpop.permute.xlu1 %3054 }
 0x5d2   : > { %v3057_v22 = vunpack.i.h.bf16 %v3055_v19  ;;  %v3056_v26 = vunpack.i.l.bf16 %v3055_v19 }
 0x5d4   : > { %v1848_v32 = vsel %vm1846_vm4, %v1845_v28, %v3057_v22  ;;  %v1847_v33 = vsel %vm1846_vm4, %v1844_v29, %v3056_v26  ;;  %v2662_v29 = vld [vmem:[%s622_s30] ss:$0 sm:$0xff]  ;;  %s4170_s30 = scalar_lea.vmem %s4126_s7, %s3742_s28 }
 0x5d5   : > { %v2679_v58 = vld [vmem:[%s4170_s30] ss:$0 sm:$0xff] }
 0x5d9   : > { %v3060_v27 = vpop.permute.xlu0 %3059 }
 0x5da   : > { %v3062_v30 = vunpack.i.h.bf16 %v3060_v27  ;;  %v3061_v31 = vunpack.i.l.bf16 %v3060_v27 }
 0x5dc   : > { %v1851_v34 = vsel %vm1849_vm5, %v1848_v32, %v3062_v30  ;;  %v1850_v36 = vsel %vm1849_vm5, %v1847_v33, %v3061_v31 }
 0x5dd   : > { %v1852_v37 = vpack.c.bf16 %v1851_v34, %v1850_v36  ;;  %v3138_v34 = vld [vmem:[%s3734_s1 + $0x28] sm:$0xff]   ;;  %v3139_v36 = vld [vmem:[%s3734_s1 + $0x70] sm:$0xff]  }
 0x5df   : > { %2910 = vmatmul.mubr.bf16.vlgmr.msra.gmra.mrb[28].mxu0 %v1852_v37  ;;  %v3140_v37 = vld [vmem:[%s3734_s1 + $0x30] sm:$0xff]  }
 0x5e0   : > { %2756 = vmatpush3.bf16.msra.mxu0 %v3128_v6 }
 0x5e1   : > { %2757 = vmatprep.subr.bf16.mxu0 %v3129_v7 }
 0x5e4   : > { %2758 = vmatpush3.bf16.msra.mxu0 %v3130_v8 }
 0x5e5   : > { %2759 = vmatprep.subr.bf16.mxu0 %v3131_v25 }
 0x5e8   : > { %2760 = vmatpush3.bf16.msra.mxu0 %v3132_v9 }
 0x5e9   : > { %2761 = vmatprep.subr.bf16.mxu0 %v3133_v10 }
 0x5ec   : > { %2762 = vmatpush3.bf16.msra.mxu0 %v3134_v11 }
 0x5ed   : > { %2763 = vmatprep.subr.bf16.mxu0 %v3135_v12 }
 0x5f0   : > { %2764 = vmatpush3.bf16.msra.mxu0 %v3136_v13 }
 0x5f1   : > { %2765 = vmatprep.subr.bf16.mxu0 %v3137_v14 }
 0x5f4   : > { %2766 = vmatpush3.bf16.msra.mxu0 %v3138_v34 }
 0x5f5   : > { %2767 = vmatprep.subr.bf16.mxu0 %v3139_v36 }
 0x5f8   : > { %2768 = vmatpush3.bf16.msra.mxu0 %v3140_v37 }
 0x6b2   : > { %v1958_v35 = vpop.f32.mrb[28].mxu0 }
 0x6b3   : > { %v1959_v39 = vadd.f32 %v2652_v38, %v1958_v35  ;;  %v2911_v40 = vpop.f32.mrb[29].mxu0  ;;  %v3142_v35 = vld [vmem:[%s3734_s1 + $0x38] sm:$0xff]  }
 0x6b4   : > { %v1961_v41 = vpop.f32.mrb[30].mxu0 }
 0x6b5   : > { %v1962_v42 = vadd.f32 %v2652_v38, %v1961_v41  ;;  %v2912_v43 = vpop.f32.mrb[31].mxu0  ;;  %v1965_v44 = vadd.f32 %v1959_v39, %v3813_v23  ;;  %v3141_v38 = vld [vmem:[%s3734_s1 + $0x78] sm:$0xff]   ;;  %v2027_v39 = vlaneseq }
 0x6b6   : > { %2769 = vmatprep.subr.bf16.mxu0 %v3141_v38 }
 0x6b7   : > { %1969 = vadd.xlane.f32.xlu1 %v1965_v44  ;;  %v1966_v45 = vadd.f32 %v1962_v42, %v3815_v24  ;;  %2770 = vmatpush3.bf16.msra.mxu0 %v3142_v35  ;;  %v2028_v40 = vshrl.u32 %v2027_v39, 7  ;;  %v2025_v42 = vld [vmem:[%s3752_s12] sm:$0x3] }
 0x6b9   : > { %1971 = vadd.xlane.f32.xlu0 %v1966_v45  ;;  %v2029_v41 = vsub.s32 0, %v2028_v40  ;;  %v2033_v43 = vsub.s32 1, %v2028_v40 }
 0x744   : > { %v1970_v50 = vpop.xlane.xlu1 %1969 }
 0x745   : > { %v1974_v2 = vmul.f32 0.0078125, %v1970_v50 }
 0x746   : > { %v1972_v51 = vpop.xlane.xlu0 %1971 }
 0x747   : > { %v4014_v23 = vsub.f32 %v1965_v44, %v1974_v2  ;;  %v1975_v24 = vmul.f32 0.0078125, %v1972_v51  ;;  %v2030_v44 = vrot.slane %v2025_v42, %v2029_v41 }
 0x749   : > { %v4016_v52 = vsub.f32 %v1966_v45, %v1975_v24  ;;  %v1978_v53 = vmul.f32 %v4014_v23, %v4014_v23  ;;  %v2034_v45 = vrot.slane %v2025_v42, %v2033_v43 }
 0x74b   : > { %1980 = vadd.xlane.f32.xlu0 %v1978_v53  ;;  %v1979_v54 = vmul.f32 %v4016_v52, %v4016_v52 }
 0x74d   : > { %1982 = vadd.xlane.f32.xlu1 %v1979_v54 }
 0x7d8   : > { %v1981_v15 = vpop.xlane.xlu0 %1980 }
 0x7d9   : > { %v1984_v16 = vmul.f32 0.0078125, %v1981_v15 }
 0x7da   : > { %v1983_v17 = vpop.xlane.xlu1 %1982 }
 0x7db   : > { %v1986_v3 = vadd.f32 1e-06, %v1984_v16  ;;  %v1985_v18 = vmul.f32 0.0078125, %v1983_v17 }
 0x7dd   : > { %3175 = vrsqrt.f32 %v1986_v3  ;;  %v1987_v19 = vadd.f32 1e-06, %v1985_v18 }
 0x7df   : > { %3177 = vrsqrt.f32 %v1987_v19  ;;  %v2696_v19 = vld [vmem:[%s625_s6] ss:$0 sm:$0xff]  ;;  %s3325_s6 = scalar_lea.vmem %s2396_s29, 256 }
 0x7e0   : > { %p3326_p3 = scmp.ne.s32.totalorder %s2396_s29, %s3325_s6  ;;  %p3333_p4 = scmp.lt.s32.totalorder %s3325_s6, %s3325_s6 }
 0x7e2   : > { %p3327_p12 = pnand %p3326_p3, %p2942_p10  ;;  %p3334_p6 = por %p3333_p4, %p3332_p9 }
 0x7e4   : > { %p3328_p7 = pneg %p3327_p12 }
 0x7e6   : > { %p3335_p8 = pnand %p3334_p6, %p3328_p7 }
 0x7e7   : > { %v3176_v20 = vpop.eup %3175 }
 0x7e8   : > { %v1990_v22 = vmul.f32 %v3176_v20, %v4014_v23 }
 0x7e9   : > { %v3178_v26 = vpop.eup %3177 }
 0x7ea   : > { %v1991_v27 = vmul.f32 %v3178_v26, %v4016_v52  ;;  %v1998_v28 = vmul.f32 %v2661_v21, %v1990_v22  ;;  %v2697_v22 = vld [vmem:[%s628_s13] ss:$0 sm:$0xff] }
 0x7ec   : > { %v1999_v30 = vmul.f32 %v2661_v21, %v1991_v27  ;;  %v2006_v31 = vadd.f32 %v2662_v29, %v1998_v28 }
 0x7ee   : > { %v2007_v32 = vadd.f32 %v2662_v29, %v1999_v30 }
 0x7f0   : > { %v2008_v33 = vpack.c.bf16 %v2007_v32, %v2006_v31 }
 0x7f2   : > { %2150 = vmatmul.mubr.bf16.vlgmr.msra.gmra.mrb[44].mxu1 %v2008_v33 }
 0x8c5   : > { %v2151_v46 = vpop.f32.mrb[44].mxu1 }
 0x8c6   : > { %v2152_v47 = vadd.f32 %v2151_v46, %v2030_v44  ;;  %v2153_v48 = vpop.f32.mrb[45].mxu1 }
 0x8c7   : > { %v2154_v49 = vadd.f32 %v2153_v48, %v2034_v45  ;;  %v2155_v50 = vpop.f32.mrb[46].mxu1 }
 0x8c8   : > { %v2156_v2 = vadd.f32 %v2155_v50, %v2030_v44  ;;  %v2157_v51 = vpop.f32.mrb[47].mxu1  ;;  %v2160_v24 = vmax.f32 %v2152_v47, 0.0 }
 0x8c9   : > { %v2158_v23 = vadd.f32 %v2157_v51, %v2034_v45  ;;  %v2161_v53 = vmax.f32 %v2154_v49, 0.0 }
 0x8ca   : > { %v2162_v52 = vmax.f32 %v2156_v2, 0.0 }
 0x8cb   : > { %v2163_v54 = vmax.f32 %v2158_v23, 0.0 }
 0x8cc   : > { %v2164_v55 = vpack.c.bf16 %v2162_v52, %v2160_v24 }
 0x8cd   : > { %v2165_v56 = vpack.c.bf16 %v2163_v54, %v2161_v53 }
 0x8cf   : > { %2333 = vmatprep.mubr.bf16.mxu0 %v2165_v56 }
 0x8d0   : > { %2334 = vmatmul.mubr.bf16.vlgmr.msra.gmra.mrb[32].mxu0 %v2164_v55 }
 0x9a3   : > { %v2771_v57 = vpop.f32.mrb[32].mxu0 }
 0x9a4   : > { %v2772_v59 = vpop.f32.mrb[33].mxu0 }
 0x9a5   : > { %v2773_v60 = vadd.f32 %v2772_v59, %v2771_v57  ;;  %v2774_v61 = vpop.f32.mrb[34].mxu0 }
 0x9a6   : > { %v2775_v62 = vpop.f32.mrb[35].mxu0 }
 0x9a7   : > { %v2336_v63 = vadd.f32 %v2773_v60, %v2679_v58  ;;  %v2776_v0 = vadd.f32 %v2775_v62, %v2774_v61 }
 0x9a9   : > { %v2339_v1 = vadd.f32 %v2776_v0, %v2679_v58  ;;  %v2342_v4 = vadd.f32 %v2336_v63, %v2006_v31 }
 0x9ab   : > { %2346 = vadd.xlane.f32.xlu0 %v2342_v4  ;;  %v2343_v5 = vadd.f32 %v2339_v1, %v2007_v32 }
 0x9ad   : > { %2348 = vadd.xlane.f32.xlu1 %v2343_v5 }
 0xa38   : > { %v2347_v6 = vpop.xlane.xlu0 %2346 }
 0xa39   : > { %v2350_v7 = vmul.f32 0.0078125, %v2347_v6 }
 0xa3a   : > { %v2349_v8 = vpop.xlane.xlu1 %2348 }
 0xa3b   : > { %v2352_v25 = vsub.f32 %v2342_v4, %v2350_v7  ;;  %v2351_v9 = vmul.f32 0.0078125, %v2349_v8 }
 0xa3d   : > { %v2353_v10 = vsub.f32 %v2343_v5, %v2351_v9  ;;  %v2354_v11 = vmul.f32 %v2352_v25, %v2352_v25 }
 0xa3f   : > { %2356 = vadd.xlane.f32.xlu0 %v2354_v11  ;;  %v2355_v12 = vmul.f32 %v2353_v10, %v2353_v10 }
 0xa41   : > { %2358 = vadd.xlane.f32.xlu1 %v2355_v12 }
 0xacc   : > { %v2357_v13 = vpop.xlane.xlu0 %2356 }
 0xacd   : > { %v2360_v14 = vmul.f32 0.0078125, %v2357_v13 }
 0xace   : > { %v2359_v15 = vpop.xlane.xlu1 %2358 }
 0xacf   : > { %v2362_v16 = vadd.f32 1e-06, %v2360_v14  ;;  %v2361_v17 = vmul.f32 0.0078125, %v2359_v15 }
 0xad1   : > { %3179 = vrsqrt.f32 %v2362_v16  ;;  %v2363_v3 = vadd.f32 1e-06, %v2361_v17 }
 0xad3   : > { %3181 = vrsqrt.f32 %v2363_v3 }
 0xadb   : > { %v3180_v18 = vpop.eup %3179 }
 0xadc   : > { %v2366_v20 = vmul.f32 %v3180_v18, %v2352_v25 }
 0xadd   : > { %v3182_v21 = vpop.eup %3181 }
 0xade   : > { %v2367_v26 = vmul.f32 %v3182_v21, %v2353_v10  ;;  %v2374_v27 = vmul.f32 %v2696_v19, %v2366_v20 }
 0xae0   : > { %v2375_v28 = vmul.f32 %v2696_v19, %v2367_v26  ;;  %v2382_v29 = vadd.f32 %v2697_v22, %v2374_v27 }
 0xae2   : > { %v2383_v30 = vadd.f32 %v2697_v22, %v2375_v28  ;;  %2384 = vst [vmem:[#allocation10] sm:$0xff] %v2382_v29 }
 0xae4   : > { %2385 = vst [vmem:[#allocation10 + $0x8] sm:$0xff] %v2383_v30 }
 0xae5   : > { %3338 = shalt.err (!%p3335_p8)
}
 0xae6   : > { %s4172_s21 = sld [smem:[#allocation32_spill]] }
 0xaec   : > { %s4173_s0 = smov %s4172_s21  ;;  %s3339_s14 = scalar_lea.hbm %s4172_s21, 256 }
 0xaed   : > { %p3340_p0 = scmp.ne.s32.totalorder %s4173_s0, %s3339_s14  ;;  %p3345_p1 = scmp.lt.u32.totalorder %s3339_s14, %s4173_s0 }
 0xaef   : > { %p3341_p5 = pnand %p3340_p0, %p2942_p10 }
 0xaf1   : > { %p3342_p13 = pneg %p3341_p5 }
 0xaf3   : > { %p3347_p11 = pnand %p3345_p1, %p3342_p13 }
 0xaf5   : > { %3350 = shalt.err (!%p3347_p11)
}
 0xaf6   : > { %s3435_s17 = smov 128   ;;  %s3436_s11 = smov 8  }
 0xaf7   : > { %2925 = dma.vmem_to_hbm [thread:$0]  (%p2942_p10), %s2396_s29, 256, %s4173_s0, [#allocation4], %s3435_s17, %s3435_s17, %s3436_s11  }
 0xaf8   : > { %3390 = dma.done.wait (%p2942_p10), [#allocation4], 256  }
 0xaf9   : > { %3392 = vsyncadd (%p2942_p10), [#allocation4], 4294967040 }
 0xafa PF: > { %s4174_s30 = sld [smem:[#allocation23_spill]]  ;;  %s4175_s4 = sld [smem:[#allocation21_spill]] }
 0xafb   : > { %s4176_s23 = sld [smem:[#allocation25_spill]]  ;;  %s4177_s24 = sld [smem:[#allocation22_spill]] }
 0xafc   : > { %s4178_s25 = sld [smem:[#allocation24_spill]]  ;;  %s4179_s21 = smov %s3399_s22 }
 0xb00   : > { %s32_s26 = sadd.s32 1, %s4174_s30   ;;  %s4180_s22 = smov %s4175_s4 }
 0xb01   : > { %p29_p2 = scmp.ge.s32.totalorder %s32_s26, 4  }
 0xb03   :  { %31 = sbr.rel (!%p29_p2) target bundleno = 17 (0x11), region = 170 }
 0xb0a   :  { %2411 = vsyncpa [#allocation3], 1 }
 0xb0b   :  { %2413 = vsyncpa [#allocation3 + $0x1], 1 }
 0xb0c   :  { %2414 = vsyncpa [#allocation6], 1 }
 0xb0d   :  { %2416 = vsyncpa [#allocation6 + $0x1], 1 }
 0xb0e   :  { %2417 = vsyncpa [#allocation9], 1 }
 0xb0f   :  { %2419 = vsyncpa [#allocation9 + $0x1], 1 }
 0xb10   :  { %2420 = vsyncpa [#allocation4], 1 }
 0xb11   :  { %2422 = vsyncpa [#allocation4 + $0x1], 1 }

</bundles_post_ra>
